<compile_context>
chip_gen: v7x
topology: tpu7x:2x2x1
jax: 0.10.0
libtpu: 0.0.40
codegen_flags: <defaults>
</compile_context>

<pallas_src>
import functools

import jax
import jax.numpy as jnp
import numpy as np
from jax.experimental import pallas as pl
from jax.experimental.pallas import tpu as pltpu


# ----------------------------- host-side precompute -----------------------------

def _centered_idft_matrix(n: int) -> np.ndarray:
    """A = P_ifftshift @ IDFT @ P_ifftshift (valid for even n)."""
    s = n // 2
    k = (np.arange(n) + s) % n
    # IDFT[k, m] = exp(+2j*pi*k*m/n)/n ; both ifftshifts fold into the exponent.
    return np.exp(2j * np.pi * np.outer(k, k) / n) / n


def _interleaved_operator_T(H: int, W: int) -> np.ndarray:
    """Real (2HW, 2HW) matrix Mt such that  y_flat = x_flat @ Mt  implements the
    centered ifft2 on row-major-flattened, re/im-interleaved pixels."""
    Kc = np.kron(_centered_idft_matrix(H), _centered_idft_matrix(W))  # (HW, HW) complex
    HW = H * W
    M = np.empty((2 * HW, 2 * HW), dtype=np.float64)
    M[0::2, 0::2] = Kc.real
    M[0::2, 1::2] = -Kc.imag
    M[1::2, 0::2] = Kc.imag
    M[1::2, 1::2] = Kc.real
    return np.ascontiguousarray(M.T).astype(np.float32)


@functools.lru_cache(maxsize=None)
def _operator_bf16_split(H: int, W: int):
    """Device-cached hi/lo bf16 split of the (L, L) operator (built once per (H, W))."""
    m32 = jnp.asarray(_interleaved_operator_T(H, W))                  # (L, L) f32, on device
    m_hi = m32.astype(jnp.bfloat16)
    m_lo = (m32 - m_hi.astype(jnp.float32)).astype(jnp.bfloat16)
    return m_hi, m_lo


def _round_up(x: int, m: int) -> int:
    return ((x + m - 1) // m) * m


# ----------------------------------- kernel -------------------------------------

def _tifft2_kernel(x_ref, m_hi_ref, m_lo_ref, o_ref):
    # Split the f32 input tile into hi/lo bf16 halves (VPU) and run three accumulating
    # bf16 MXU matmuls: (x_hi + x_lo) @ (M_hi + M_lo), dropping the negligible lo@lo term.
    x = x_ref[...]                                         # (TM, L) f32
    x_hi = x.astype(jnp.bfloat16)
    x_lo = (x - x_hi.astype(jnp.float32)).astype(jnp.bfloat16)
    m_hi = m_hi_ref[...]
    m_lo = m_lo_ref[...]
    acc = jnp.dot(x_hi, m_hi, preferred_element_type=jnp.float32)
    acc = acc + jnp.dot(x_lo, m_hi, preferred_element_type=jnp.float32)
    acc = acc + jnp.dot(x_hi, m_lo, preferred_element_type=jnp.float32)
    o_ref[...] = acc


# ---------------------------------- wrapper -------------------------------------

def tifft2(x: jax.Array) -> jax.Array:
    """x: (B, C, H, W, 2) float -> (B, C, H, W, 2) float32 centered ifft2."""
    B, C, H, W, two = x.shape
    assert two == 2
    assert H % 2 == 0 and W % 2 == 0, "centered-IDFT folding requires even H, W"
    L = 2 * H * W
    # TODO(synk): for large H*W (operator > VMEM, esp. v7x), fall back to the factored
    #             A_H @ X @ A_W^T two-stage form with K-tiling.
    assert L <= 2048, "Kronecker operator path only for small H*W"

    BC = B * C
    m_hi, m_lo = _operator_bf16_split(H, W)                # cached on device

    if x.dtype != jnp.float32:
        x = x.astype(jnp.float32)
    xf = x.reshape(BC, L)                                  # metadata-only reshape

    # Only pad in the degenerate < 8-row case (sublane minimum); otherwise no pad/slice
    # HBM passes — the partial last grid block is masked by Pallas.
    rows = BC
    if rows < 8:
        xf = jnp.pad(xf, ((0, 8 - rows), (0, 0)))
        rows = 8

    # Large TM amortizes the per-step pipeline overhead; cap so the "parallel" grid axis
    # keeps >= 2 steps when rows allow it (v7x megacore). Multiple of 8 sublanes (f32).
    TM = min(512, _round_up(pl.cdiv(rows, 2), 8))
    grid = (pl.cdiv(rows, TM),)

    # VMEM budget derived from actual tile sizes (double-buffered in/out + 2 operator halves).
    x_tile_bytes = TM * L * 4
    m_tile_bytes = L * L * 2
    vmem_need = 2 * (2 * x_tile_bytes) + 2 * (2 * m_tile_bytes)
    vmem_limit = min(2 * vmem_need + (8 << 20), 64 << 20)

    out = pl.pallas_call(
        _tifft2_kernel,
        out_shape=jax.ShapeDtypeStruct((rows, L), jnp.float32),
        grid_spec=pltpu.PrefetchScalarGridSpec(
            num_scalar_prefetch=0,
            grid=grid,
            in_specs=[
                pl.BlockSpec((TM, L), lambda i: (i, 0)),   # image rows
                pl.BlockSpec((L, L), lambda i: (0, 0)),    # constant operator (hi)
                pl.BlockSpec((L, L), lambda i: (0, 0)),    # constant operator (lo)
            ],
            out_specs=pl.BlockSpec((TM, L), lambda i: (i, 0)),
        ),
        compiler_params=pltpu.CompilerParams(
            dimension_semantics=("parallel",),
            vmem_limit_bytes=vmem_limit,
        ),
    )(xf, m_hi, m_lo)

    if rows != BC:
        out = out[:BC]
    return out.reshape(B, C, H, W, 2)


# --------------------------------- reference ------------------------------------

def _reference(x):
    xc = x[..., 0] + 1j * x[..., 1]
    it = jnp.fft.ifftshift(xc, axes=(-2, -1))
    it = jnp.fft.ifft2(it)
    it = jnp.fft.ifftshift(it, axes=(-2, -1))
    return jnp.stack([it.real, it.imag], axis=-1).astype(jnp.float32)


if __name__ == "__main__":
    key = jax.random.PRNGKey(0)
    B, C, H, W = 2, 4, 16, 16
    x = jax.random.normal(key, (B, C, H, W, 2), dtype=jnp.float32)

    out = jax.block_until_ready(tifft2(x))

    ref = _reference(x)
    assert out.shape == (B, C, H, W, 2)
    max_err = float(jnp.max(jnp.abs(out - ref)))
    assert jnp.allclose(out, ref, atol=1e-4, rtol=1e-4), f"max abs err = {max_err}"

    print("KERNEL_OK")
</pallas_src>

<mosaic_0001>
module attributes {stable_mosaic.version = 11 : i64} {
  func.func @_tifft2_kernel(%arg0: i32, %arg1: memref<8x512xf32, #tpu.memory_space<vmem>>, %arg2: memref<512x512xbf16, #tpu.memory_space<vmem>>, %arg3: memref<512x512xbf16, #tpu.memory_space<vmem>>, %arg4: memref<8x512xf32, #tpu.memory_space<vmem>>) attributes {dimension_semantics = [#tpu.dimension_semantics<parallel>], iteration_bounds = array<i64: 1>, scalar_prefetch = 0 : i64, scratch_operands = 0 : i64, tpu.core_type = #tpu.core_type<tc>, window_params = [{transform_indices = @transform_0, window_bounds = array<i64: 8, 512>}, {pipeline_mode = #tpu.pipeline_mode<synchronous>, transform_indices = @transform_1, window_bounds = array<i64: 512, 512>}, {pipeline_mode = #tpu.pipeline_mode<synchronous>, transform_indices = @transform_2, window_bounds = array<i64: 512, 512>}, {transform_indices = @transform_3, window_bounds = array<i64: 8, 512>}]} {
    %c0 = arith.constant 0 : index
    %c0_0 = arith.constant 0 : index
    %0 = vector.load %arg1[%c0, %c0_0] : memref<8x512xf32, #tpu.memory_space<vmem>>, vector<8x512xf32>
    %1 = arith.truncf %0 : vector<8x512xf32> to vector<8x512xbf16>
    %2 = arith.extf %1 : vector<8x512xbf16> to vector<8x512xf32>
    %3 = arith.subf %0, %2 : vector<8x512xf32>
    %4 = arith.truncf %3 : vector<8x512xf32> to vector<8x512xbf16>
    %c0_1 = arith.constant 0 : index
    %c0_2 = arith.constant 0 : index
    %5 = vector.load %arg2[%c0_1, %c0_2] : memref<512x512xbf16, #tpu.memory_space<vmem>>, vector<512x512xbf16>
    %c0_3 = arith.constant 0 : index
    %c0_4 = arith.constant 0 : index
    %6 = vector.load %arg3[%c0_3, %c0_4] : memref<512x512xbf16, #tpu.memory_space<vmem>>, vector<512x512xbf16>
    %cst = arith.constant dense<0.000000e+00> : vector<8x512xf32>
    %7 = tpu.matmul %1, %5, %cst {dimension_numbers = #tpu.dot_dimension_numbers<[1], [0], [0], [1], [0, 0, 1, 1], [], []>} : vector<8x512xbf16>, vector<512x512xbf16>, vector<8x512xf32> -> vector<8x512xf32>
    %cst_5 = arith.constant dense<0.000000e+00> : vector<8x512xf32>
    %8 = tpu.matmul %4, %5, %cst_5 {dimension_numbers = #tpu.dot_dimension_numbers<[1], [0], [0], [1], [0, 0, 1, 1], [], []>} : vector<8x512xbf16>, vector<512x512xbf16>, vector<8x512xf32> -> vector<8x512xf32>
    %9 = arith.addf %7, %8 : vector<8x512xf32>
    %cst_6 = arith.constant dense<0.000000e+00> : vector<8x512xf32>
    %10 = tpu.matmul %1, %6, %cst_6 {dimension_numbers = #tpu.dot_dimension_numbers<[1], [0], [0], [1], [0, 0, 1, 1], [], []>} : vector<8x512xbf16>, vector<512x512xbf16>, vector<8x512xf32> -> vector<8x512xf32>
    %11 = arith.addf %9, %10 : vector<8x512xf32>
    %c0_7 = arith.constant 0 : index
    %c0_8 = arith.constant 0 : index
    %12 = vector.load %arg4[%c0_7, %c0_8] : memref<8x512xf32, #tpu.memory_space<vmem>>, vector<8x512xf32>
    tpu.vector_store %arg4[%c0_7, %c0_8], %11 {strides = array<i32>} : memref<8x512xf32, #tpu.memory_space<vmem>>, vector<8x512xf32>,
    return
  }
  func.func @transform_0(%arg0: i32) -> (i32, i32) {
    %c0_i32 = arith.constant 0 : i32
    %c0_i32_0 = arith.constant 0 : i32
    return %arg0, %c0_i32 : i32, i32
  }
  func.func @transform_1(%arg0: i32) -> (i32, i32) {
    %c0_i32 = arith.constant 0 : i32
    %c0_i32_0 = arith.constant 0 : i32
    %c0_i32_1 = arith.constant 0 : i32
    return %c0_i32, %c0_i32_0 : i32, i32
  }
  func.func @transform_2(%arg0: i32) -> (i32, i32) {
    %c0_i32 = arith.constant 0 : i32
    %c0_i32_0 = arith.constant 0 : i32
    %c0_i32_1 = arith.constant 0 : i32
    return %c0_i32, %c0_i32_0 : i32, i32
  }
  func.func @transform_3(%arg0: i32) -> (i32, i32) {
    %c0_i32 = arith.constant 0 : i32
    %c0_i32_0 = arith.constant 0 : i32
    return %arg0, %c0_i32 : i32, i32
  }
}

</mosaic_0001>

<bundles_post_ra>
// kernel: tpu_custom_call.1
= control target key start
LH: loop header
LB: loop body
LE: loop exit
PB: predicated region body
PF: predicated region fallthrough
CT: control target
= control target key end

     0   :  { %8 = vsyncpa [#allocation3], 0  ;;  %s3481_s0 = inlined_call_operand.hbm [shape: f32[8,512], index: 0, kind: input, shape index: {}]   ;;  %s3482_s1 = inlined_call_operand.hbm [shape: bf16[512,512], index: 1, kind: input, shape index: {}]   ;;  %s3483_s2 = inlined_call_operand.hbm [shape: bf16[512,512], index: 2, kind: input, shape index: {}]   ;;  %s3484_s3 = inlined_call_operand.hbm [shape: f32[8,512], index: 3, kind: output, shape index: {}]  }
   0x1   :  { %9 = vsyncpa [#allocation6], 0 }
   0x2   :  { %10 = vsyncpa [#allocation4], 0  ;;  %s2921_s12 = smov [#allocation5]   ;;  %s2827_s16 = scalar_lea.hbm %s3482_s1, 16384 }
   0x3   :  { %s26_s13 = sshll.u32 %s2921_s12, 4  ;;  %p2828_p0 = scmp.ne.s32.totalorder %s3482_s1, %s2827_s16  ;;  %s27_s13 = int_to_ptr.vmem [resolvable:$true] %s26_s13 }
   0x4   :  { %p2831_p1 = scmp.lt.u32.totalorder %s2827_s16, %s3482_s1 }
   0x6   :  { %p2833_p2 = pnand %p2831_p1, %p2828_p0 }
   0x8   :  { %2836 = shalt.err (!%p2833_p2)
}
   0x9   :  { %s2837_s21 = scalar_lea.vmem %s27_s13, 16384  ;;  %p2842_p4 = scmp.lt.s32.totalorder %s27_s13, %s27_s13 }
   0xa   :  { %p2838_p3 = scmp.ne.s32.totalorder %s27_s13, %s2837_s21  ;;  %p2843_p5 = scmp.lt.s32.totalorder %s2837_s21, %s2837_s21 }
   0xc   :  { %p2844_p6 = por %p2843_p5, %p2842_p4 }
   0xe   :  { %p2845_p7 = pnand %p2844_p6, %p2838_p3 }
  0x10   :  { %2848 = shalt.err (!%p2845_p7)
}
  0x11   :  { %s2922_s22 = smov 256   ;;  %s2923_s23 = smov 16  }
  0x12   :  { %32 = dma.hbm_to_vmem [thread:$0]  %s3482_s1, 16384, %s27_s13, [#allocation6], %s2922_s22, %s2922_s22, %s2923_s23  }
  0x13   :  { %s2924_s26 = smov [#allocation2]   ;;  %s2925_s28 = smov [#allocation7]  }
  0x14   :  { %s17_s27 = sshll.u32 %s2924_s26, 4  ;;  %s38_s29 = sshll.u32 %s2925_s28, 4  ;;  %s18_s27 = int_to_ptr.vmem [resolvable:$true] %s17_s27  ;;  %s39_s29 = int_to_ptr.vmem [resolvable:$true] %s38_s29 }
  0x15   :  { %s2849_s5 = scalar_lea.hbm %s3481_s0, 512 }
  0x16   :  { %p2850_p8 = scmp.ne.s32.totalorder %s3481_s0, %s2849_s5  ;;  %p2853_p9 = scmp.lt.u32.totalorder %s2849_s5, %s3481_s0 }
  0x18   :  { %p2855_p10 = pnand %p2853_p9, %p2850_p8 }
  0x1a   :  { %2858 = shalt.err (!%p2855_p10)
}
  0x1b   :  { %s2859_s1 = scalar_lea.vmem %s18_s27, 512  ;;  %p2864_p12 = scmp.lt.s32.totalorder %s18_s27, %s18_s27 }
  0x1c   :  { %p2860_p11 = scmp.ne.s32.totalorder %s18_s27, %s2859_s1  ;;  %p2865_p13 = scmp.lt.s32.totalorder %s2859_s1, %s2859_s1 }
  0x1e   :  { %p2866_p0 = por %p2865_p13, %p2864_p12 }
  0x20   :  { %p2867_p1 = pnand %p2866_p0, %p2860_p11 }
  0x22   :  { %2870 = shalt.err (!%p2867_p1)
}
  0x23   :  { %20 = dma.hbm_to_vmem [thread:$0]  %s3481_s0, 512, %s18_s27, [#allocation3]  }
  0x24   :  { %s2871_s14 = scalar_lea.hbm %s3483_s2, 16384 }
  0x25   :  { %p2872_p2 = scmp.ne.s32.totalorder %s3483_s2, %s2871_s14  ;;  %p2875_p3 = scmp.lt.u32.totalorder %s2871_s14, %s3483_s2 }
  0x27   :  { %p2877_p4 = pnand %p2875_p3, %p2872_p2 }
  0x29   :  { %2880 = shalt.err (!%p2877_p4)
}
  0x2a   :  { %s2881_s19 = scalar_lea.vmem %s39_s29, 16384  ;;  %p2886_p6 = scmp.lt.s32.totalorder %s39_s29, %s39_s29 }
  0x2b   :  { %p2882_p5 = scmp.ne.s32.totalorder %s39_s29, %s2881_s19  ;;  %p2887_p7 = scmp.lt.s32.totalorder %s2881_s19, %s2881_s19 }
  0x2d   :  { %p2888_p8 = por %p2887_p7, %p2886_p6 }
  0x2f   :  { %p2889_p9 = pnand %p2888_p8, %p2882_p5 }
  0x31   :  { %2892 = shalt.err (!%p2889_p9)
}
  0x32   :  { %44 = dma.hbm_to_vmem [thread:$0]  %s3483_s2, 16384, %s39_s29, [#allocation6], %s2922_s22, %s2922_s22, %s2923_s23  }
  0x33   :  { %2915 = dma.done.wait [#allocation3], 512  }
  0x34   :  { %2916 = vsyncadd [#allocation3], 4294966784 }
  0x35   :  { %2917 = dma.done.wait [#allocation6], 32768  }
  0x36   :  { %2918 = vsyncadd [#allocation6], 4294934528  ;;  %v2428_v0 = vld [vmem:[#allocation5 + $0x4] ss:$16 sps:$4 sm:$0xff]   ;;  %v2430_v1 = vld [vmem:[#allocation5 + $0xc] ss:$16 sps:$4 sm:$0xff]  }
  0x37   :  { %970 = vmatprep.subr.bf16.mxu0 %v2428_v0  ;;  %v2432_v2 = vld [vmem:[#allocation5] ss:$16 sps:$4 sm:$0xff]   ;;  %v2433_v3 = vld [vmem:[#allocation5 + $0x8] ss:$16 sps:$4 sm:$0xff]   ;;  %1052 = vmatprep.subr.bf16.mxu1 %v2430_v1  ;;  %v2434_v4 = vld [vmem:[#allocation5 + $0x24] ss:$16 sps:$4 sm:$0xff]  }
  0x38   :  { %971 = vmatpush1.bf16.msra.mxu0 %v2432_v2  ;;  %1053 = vmatpush1.bf16.msra.mxu1 %v2433_v3  ;;  %v2436_v5 = vld [vmem:[#allocation5 + $0x2c] ss:$16 sps:$4 sm:$0xff]   ;;  %v2438_v6 = vld [vmem:[#allocation5 + $0x20] ss:$16 sps:$4 sm:$0xff]   ;;  %v2439_v7 = vld [vmem:[#allocation5 + $0x28] ss:$16 sps:$4 sm:$0xff]  }
  0x39   :  { %972 = vmatprep.subr.bf16.mxu0 %v2434_v4  ;;  %1054 = vmatprep.subr.bf16.mxu1 %v2436_v5  ;;  %v2440_v8 = vld [vmem:[#allocation5 + $0x44] ss:$16 sps:$4 sm:$0xff]   ;;  %v2442_v9 = vld [vmem:[#allocation5 + $0x4c] ss:$16 sps:$4 sm:$0xff]   ;;  %v2444_v10 = vld [vmem:[#allocation5 + $0x40] ss:$16 sps:$4 sm:$0xff]  }
  0x3a   :  { %v2445_v11 = vld [vmem:[#allocation5 + $0x48] ss:$16 sps:$4 sm:$0xff]   ;;  %v2446_v12 = vld [vmem:[#allocation5 + $0x64] ss:$16 sps:$4 sm:$0xff]   ;;  %v2448_v13 = vld [vmem:[#allocation5 + $0x6c] ss:$16 sps:$4 sm:$0xff]  }
  0x3b   :  { %v2450_v14 = vld [vmem:[#allocation5 + $0x60] ss:$16 sps:$4 sm:$0xff]   ;;  %v2989_v15 = vld [vmem:[#allocation5 + $0x68] ss:$16 sps:$4 sm:$0xff]   ;;  %v2991_v16 = vld [vmem:[#allocation5 + $0x84] ss:$16 sps:$4 sm:$0xff]  }
  0x3c   :  { %973 = vmatpush1.bf16.msra.mxu0 %v2438_v6  ;;  %1055 = vmatpush1.bf16.msra.mxu1 %v2439_v7  ;;  %v2993_v17 = vld [vmem:[#allocation5 + $0x8c] ss:$16 sps:$4 sm:$0xff]   ;;  %v2995_v18 = vld [vmem:[#allocation5 + $0x80] ss:$16 sps:$4 sm:$0xff]   ;;  %v2997_v19 = vld [vmem:[#allocation5 + $0x88] ss:$16 sps:$4 sm:$0xff]  }
  0x3d   :  { %974 = vmatprep.subr.bf16.mxu0 %v2440_v8  ;;  %1056 = vmatprep.subr.bf16.mxu1 %v2442_v9  ;;  %v3000_v20 = vld [vmem:[#allocation5 + $0xa4] ss:$16 sps:$4 sm:$0xff]   ;;  %v3004_v21 = vld [vmem:[#allocation5 + $0xac] ss:$16 sps:$4 sm:$0xff]   ;;  %v3006_v22 = vld [vmem:[#allocation5 + $0xa0] ss:$16 sps:$4 sm:$0xff]  }
  0x3e   :  { %v3010_v23 = vld [vmem:[#allocation5 + $0xa8] ss:$16 sps:$4 sm:$0xff]   ;;  %v3012_v24 = vld [vmem:[#allocation5 + $0xc4] ss:$16 sps:$4 sm:$0xff]   ;;  %v3016_v25 = vld [vmem:[#allocation5 + $0xcc] ss:$16 sps:$4 sm:$0xff]  }
  0x3f   :  { %v3018_v26 = vld [vmem:[#allocation5 + $0xc0] ss:$16 sps:$4 sm:$0xff]   ;;  %v3020_v27 = vld [vmem:[#allocation5 + $0xc8] ss:$16 sps:$4 sm:$0xff]   ;;  %v3024_v28 = vld [vmem:[#allocation5 + $0xe4] ss:$16 sps:$4 sm:$0xff]  }
  0x40   :  { %975 = vmatpush1.bf16.msra.mxu0 %v2444_v10  ;;  %1057 = vmatpush1.bf16.msra.mxu1 %v2445_v11  ;;  %v3028_v29 = vld [vmem:[#allocation5 + $0xec] ss:$16 sps:$4 sm:$0xff]   ;;  %v3030_v30 = vld [vmem:[#allocation5 + $0xe0] ss:$16 sps:$4 sm:$0xff]   ;;  %v3034_v31 = vld [vmem:[#allocation5 + $0xe8] ss:$16 sps:$4 sm:$0xff]  }
  0x41   :  { %976 = vmatprep.subr.bf16.mxu0 %v2446_v12  ;;  %1058 = vmatprep.subr.bf16.mxu1 %v2448_v13  ;;  %v3036_v32 = vld [vmem:[#allocation5 + $0x104] ss:$16 sps:$4 sm:$0xff]   ;;  %v3040_v33 = vld [vmem:[#allocation5 + $0x10c] ss:$16 sps:$4 sm:$0xff]   ;;  %v3042_v34 = vld [vmem:[#allocation5 + $0x100] ss:$16 sps:$4 sm:$0xff]  }
  0x42   :  { %v3044_v35 = vld [vmem:[#allocation5 + $0x108] ss:$16 sps:$4 sm:$0xff]   ;;  %v3048_v36 = vld [vmem:[#allocation5 + $0x124] ss:$16 sps:$4 sm:$0xff]   ;;  %v3052_v37 = vld [vmem:[#allocation5 + $0x12c] ss:$16 sps:$4 sm:$0xff]  }
  0x43   :  { %v3054_v38 = vld [vmem:[#allocation5 + $0x120] ss:$16 sps:$4 sm:$0xff]   ;;  %v3058_v39 = vld [vmem:[#allocation5 + $0x128] ss:$16 sps:$4 sm:$0xff]   ;;  %v3060_v40 = vld [vmem:[#allocation5 + $0x144] ss:$16 sps:$4 sm:$0xff]  }
  0x44   :  { %977 = vmatpush1.bf16.msra.mxu0 %v2450_v14  ;;  %1059 = vmatpush1.bf16.msra.mxu1 %v2989_v15  ;;  %v3064_v41 = vld [vmem:[#allocation5 + $0x14c] ss:$16 sps:$4 sm:$0xff]   ;;  %v3066_v42 = vld [vmem:[#allocation5 + $0x140] ss:$16 sps:$4 sm:$0xff]   ;;  %v3068_v43 = vld [vmem:[#allocation5 + $0x148] ss:$16 sps:$4 sm:$0xff]  }
  0x45   :  { %978 = vmatprep.subr.bf16.mxu0 %v2991_v16  ;;  %1060 = vmatprep.subr.bf16.mxu1 %v2993_v17  ;;  %v3072_v44 = vld [vmem:[#allocation5 + $0x164] ss:$16 sps:$4 sm:$0xff]   ;;  %v3076_v45 = vld [vmem:[#allocation5 + $0x16c] ss:$16 sps:$4 sm:$0xff]   ;;  %v3078_v47 = vld [vmem:[#allocation5 + $0x160] ss:$16 sps:$4 sm:$0xff]  }
  0x46   :  { %v55_v46 = vld [vmem:[#allocation2 + $0x8] sm:$0xff]  ;;  %v3088_v50 = vld [vmem:[#allocation5 + $0x184] ss:$16 sps:$4 sm:$0xff]   ;;  %v3093_v53 = vld [vmem:[#allocation5 + $0x180] ss:$16 sps:$4 sm:$0xff]   ;;  %s2926_s2 = smov [#allocation8]  }
  0x47   :  { %v3080_v48 = vpack.c.bf16 %v55_v46, %v55_v46  ;;  %v3084_v49 = vld [vmem:[#allocation5 + $0x168] ss:$16 sps:$4 sm:$0xff]   ;;  %v3090_v51 = vld [vmem:[#allocation5 + $0x18c] ss:$16 sps:$4 sm:$0xff]   ;;  %v54_v56 = vld [vmem:[#allocation2] sm:$0xff]  ;;  %s2116_s21 = sshll.u32 %s2926_s2, 4  ;;  %s2117_s21 = int_to_ptr.vmem [resolvable:$true] %s2116_s21 }
  0x48   :  { %979 = vmatpush1.bf16.msra.mxu0 %v2995_v18  ;;  %1061 = vmatpush1.bf16.msra.mxu1 %v2997_v19  ;;  %v3097_v55 = vld [vmem:[#allocation5 + $0x188] ss:$16 sps:$4 sm:$0xff]   ;;  %v3101_v57 = vld [vmem:[#allocation5 + $0x1a4] ss:$16 sps:$4 sm:$0xff]   ;;  %v3103_v58 = vld [vmem:[#allocation5 + $0x1ac] ss:$16 sps:$4 sm:$0xff]   ;;  %v3105_v60 = vpack.c.bf16 %v54_v56, %v54_v56  ;;  %p2898_p11 = scmp.lt.s32.totalorder %s2117_s21, %s2117_s21 }
  0x49   :  { %980 = vmatprep.subr.bf16.mxu0 %v3000_v20  ;;  %1062 = vmatprep.subr.bf16.mxu1 %v3004_v21  ;;  %v63_v52 = vunpack.c.l.bf16 %v3080_v48  ;;  %v3109_v61 = vld [vmem:[#allocation5 + $0x1a0] ss:$16 sps:$4 sm:$0xff]   ;;  %v3111_v62 = vld [vmem:[#allocation5 + $0x1a8] ss:$16 sps:$4 sm:$0xff]   ;;  %v3115_v63 = vld [vmem:[#allocation5 + $0x1c4] ss:$16 sps:$4 sm:$0xff]  }
  0x4a   :  { %3550 = vst [vmem:[#allocation12_spill] sm:$0xff] %v3105_v60  ;;  %v3117_v0 = vld [vmem:[#allocation5 + $0x1cc] ss:$16 sps:$4 sm:$0xff]   ;;  %v62_v1 = vunpack.c.l.bf16 %v3105_v60  ;;  %v3122_v2 = vld [vmem:[#allocation5 + $0x1c0] ss:$16 sps:$4 sm:$0xff]   ;;  %s2893_s22 = scalar_lea.vmem %s2117_s21, 512 }
  0x4b   :  { %v67_v54 = vsub.f32 %v55_v46, %v63_v52  ;;  %v3124_v3 = vld [vmem:[#allocation5 + $0x1c8] ss:$16 sps:$4 sm:$0xff]   ;;  %v3128_v4 = vld [vmem:[#allocation5 + $0x1e4] ss:$16 sps:$4 sm:$0xff]   ;;  %v3130_v5 = vld [vmem:[#allocation5 + $0x1ec] ss:$16 sps:$4 sm:$0xff]   ;;  %p2894_p10 = scmp.ne.s32.totalorder %s2117_s21, %s2893_s22  ;;  %p2899_p12 = scmp.lt.s32.totalorder %s2893_s22, %s2893_s22 }
  0x4c   :  { %981 = vmatpush1.bf16.msra.mxu0 %v3006_v22  ;;  %1063 = vmatpush1.bf16.msra.mxu1 %v3010_v23  ;;  %v66_v6 = vsub.f32 %v54_v56, %v62_v1  ;;  %v3134_v7 = vld [vmem:[#allocation5 + $0x1e0] ss:$16 sps:$4 sm:$0xff]   ;;  %v3136_v8 = vld [vmem:[#allocation5 + $0x1e8] ss:$16 sps:$4 sm:$0xff]   ;;  %v3140_v9 = vld [vmem:[#allocation5 + $0x204] ss:$16 sps:$4 sm:$0xff]  }
  0x4d   :  { %982 = vmatprep.subr.bf16.mxu0 %v3012_v24  ;;  %1064 = vmatprep.subr.bf16.mxu1 %v3016_v25  ;;  %v71_v59 = vpack.c.bf16 %v67_v54, %v67_v54  ;;  %3551 = vst [vmem:[#allocation13_spill] sm:$0xff] %v3134_v7  ;;  %3552 = vst [vmem:[#allocation14_spill] sm:$0xff] %v3136_v8  ;;  %v3142_v10 = vld [vmem:[#allocation5 + $0x20c] ss:$16 sps:$4 sm:$0xff]   ;;  %v3146_v12 = vld [vmem:[#allocation5 + $0x200] ss:$16 sps:$4 sm:$0xff]   ;;  %p2900_p13 = por %p2899_p12, %p2898_p11 }
  0x4e   :  { %3553 = vst [vmem:[#allocation15_spill] sm:$0xff] %v3140_v9  ;;  %3554 = vst [vmem:[#allocation16_spill] sm:$0xff] %v3142_v10  ;;  %v70_v11 = vpack.c.bf16 %v66_v6, %v66_v6  ;;  %v3148_v13 = vld [vmem:[#allocation5 + $0x208] ss:$16 sps:$4 sm:$0xff]   ;;  %v3152_v14 = vld [vmem:[#allocation5 + $0x224] ss:$16 sps:$4 sm:$0xff]  }
  0x4f   :  { %1002 = vmatprep.mubr.bf16.mxu0 %v71_v59  ;;  %1084 = vmatprep.mubr.bf16.mxu1 %v71_v59  ;;  %3555 = vst [vmem:[#allocation17_spill] sm:$0xff] %v3146_v12  ;;  %3556 = vst [vmem:[#allocation18_spill] sm:$0xff] %v3148_v13  ;;  %v3154_v46 = vld [vmem:[#allocation5 + $0x22c] ss:$16 sps:$4 sm:$0xff]   ;;  %v3158_v52 = vld [vmem:[#allocation5 + $0x220] ss:$16 sps:$4 sm:$0xff]   ;;  %p2901_p0 = pnand %p2900_p13, %p2894_p10 }
  0x50   :  { %983 = vmatpush1.bf16.msra.mxu0 %v3018_v26  ;;  %1065 = vmatpush1.bf16.msra.mxu1 %v3020_v27  ;;  %3557 = vst [vmem:[#allocation19_spill] sm:$0xff] %v3152_v14  ;;  %3558 = vst [vmem:[#allocation20_spill] sm:$0xff] %v3154_v46  ;;  %v3160_v54 = vld [vmem:[#allocation5 + $0x228] ss:$16 sps:$4 sm:$0xff]   ;;  %v3164_v56 = vld [vmem:[#allocation5 + $0x244] ss:$16 sps:$4 sm:$0xff]  }
  0x51   :  { %984 = vmatprep.subr.bf16.mxu0 %v3024_v28  ;;  %1066 = vmatprep.subr.bf16.mxu1 %v3028_v29  ;;  %3559 = vst [vmem:[#allocation21_spill] sm:$0xff] %v3158_v52  ;;  %3560 = vst [vmem:[#allocation22_spill] sm:$0xff] %v3160_v54  ;;  %v3166_v59 = vld [vmem:[#allocation5 + $0x24c] ss:$16 sps:$4 sm:$0xff]   ;;  %v3170_v1 = vld [vmem:[#allocation5 + $0x240] ss:$16 sps:$4 sm:$0xff]  }
  0x52   :  { %3561 = vst [vmem:[#allocation23_spill] sm:$0xff] %v3164_v56  ;;  %3562 = vst [vmem:[#allocation24_spill] sm:$0xff] %v3166_v59  ;;  %v3172_v6 = vld [vmem:[#allocation5 + $0x248] ss:$16 sps:$4 sm:$0xff]  }
  0x53   :  { %3563 = vst [vmem:[#allocation25_spill] sm:$0xff] %v3170_v1  ;;  %3564 = vst [vmem:[#allocation26_spill] sm:$0xff] %v3172_v6 }
  0x54   :  { %985 = vmatpush1.bf16.msra.mxu0 %v3030_v30  ;;  %1067 = vmatpush1.bf16.msra.mxu1 %v3034_v31 }
  0x55   :  { %986 = vmatprep.subr.bf16.mxu0 %v3036_v32  ;;  %1068 = vmatprep.subr.bf16.mxu1 %v3040_v33 }
  0x58   :  { %987 = vmatpush1.bf16.msra.mxu0 %v3042_v34  ;;  %1069 = vmatpush1.bf16.msra.mxu1 %v3044_v35 }
  0x59   :  { %988 = vmatprep.subr.bf16.mxu0 %v3048_v36  ;;  %1070 = vmatprep.subr.bf16.mxu1 %v3052_v37 }
  0x5c   :  { %989 = vmatpush1.bf16.msra.mxu0 %v3054_v38  ;;  %1071 = vmatpush1.bf16.msra.mxu1 %v3058_v39 }
  0x5d   :  { %990 = vmatprep.subr.bf16.mxu0 %v3060_v40  ;;  %1072 = vmatprep.subr.bf16.mxu1 %v3064_v41 }
  0x60   :  { %991 = vmatpush1.bf16.msra.mxu0 %v3066_v42  ;;  %1073 = vmatpush1.bf16.msra.mxu1 %v3068_v43 }
  0x61   :  { %992 = vmatprep.subr.bf16.mxu0 %v3072_v44  ;;  %1074 = vmatprep.subr.bf16.mxu1 %v3076_v45 }
  0x64   :  { %993 = vmatpush1.bf16.msra.mxu0 %v3078_v47  ;;  %1075 = vmatpush1.bf16.msra.mxu1 %v3084_v49 }
  0x65   :  { %994 = vmatprep.subr.bf16.mxu0 %v3088_v50  ;;  %1076 = vmatprep.subr.bf16.mxu1 %v3090_v51 }
  0x68   :  { %995 = vmatpush1.bf16.msra.mxu0 %v3093_v53  ;;  %1077 = vmatpush1.bf16.msra.mxu1 %v3097_v55 }
  0x69   :  { %996 = vmatprep.subr.bf16.mxu0 %v3101_v57  ;;  %1078 = vmatprep.subr.bf16.mxu1 %v3103_v58 }
  0x6c   :  { %997 = vmatpush1.bf16.msra.mxu0 %v3109_v61  ;;  %1079 = vmatpush1.bf16.msra.mxu1 %v3111_v62 }
  0x6d   :  { %998 = vmatprep.subr.bf16.mxu0 %v3115_v63  ;;  %1080 = vmatprep.subr.bf16.mxu1 %v3117_v0 }
  0x70   :  { %999 = vmatpush1.bf16.msra.mxu0 %v3122_v2  ;;  %1081 = vmatpush1.bf16.msra.mxu1 %v3124_v3 }
  0x71   :  { %1000 = vmatprep.subr.bf16.mxu0 %v3128_v4  ;;  %1082 = vmatprep.subr.bf16.mxu1 %v3130_v5 }
  0x74   :  { %1001 = vmatpush1.bf16.msra.mxu0 %v3134_v7  ;;  %1083 = vmatpush1.bf16.msra.mxu1 %v3136_v8  ;;  %v3237_v8 = vld [vmem:[#allocation5 + $0x30c] ss:$16 sps:$4 sm:$0xff]  }
  0x75   :  { %1011 = vmatprep.subr.bf16.mxu0 %v3140_v9  ;;  %1093 = vmatprep.subr.bf16.mxu1 %v3142_v10  ;;  %v3233_v10 = vld [vmem:[#allocation5 + $0x2e8] ss:$16 sps:$4 sm:$0xff]   ;;  %v3235_v9 = vld [vmem:[#allocation5 + $0x304] ss:$16 sps:$4 sm:$0xff]   ;;  %3586 = vst [vmem:[#allocation48_spill] sm:$0xff] %v3237_v8 }
  0x76   :  { %3584 = vst [vmem:[#allocation46_spill] sm:$0xff] %v3233_v10  ;;  %3585 = vst [vmem:[#allocation47_spill] sm:$0xff] %v3235_v9 }
  0x77   :  { %1003 = vmatmul.mubr.bf16.vlgmr.msra.gmra.mrb[0].mxu0 %v70_v11  ;;  %1085 = vmatmul.mubr.bf16.vlgmr.msra.gmra.mrb[0].mxu1 %v70_v11  ;;  %v3176_v11 = vld [vmem:[#allocation5 + $0x264] ss:$16 sps:$4 sm:$0xff]  }
  0x78   :  { %1012 = vmatpush1.bf16.msra.mxu0 %v3146_v12  ;;  %1094 = vmatpush1.bf16.msra.mxu1 %v3148_v13  ;;  %3565 = vst [vmem:[#allocation27_spill] sm:$0xff] %v3176_v11  ;;  %v3218_v13 = vld [vmem:[#allocation5 + $0x2c8] ss:$16 sps:$4 sm:$0xff]  }
  0x79   :  { %1013 = vmatprep.subr.bf16.mxu0 %v3152_v14  ;;  %1095 = vmatprep.subr.bf16.mxu1 %v3154_v46  ;;  %v3178_v14 = vld [vmem:[#allocation5 + $0x26c] ss:$16 sps:$4 sm:$0xff]   ;;  %v3182_v46 = vld [vmem:[#allocation5 + $0x260] ss:$16 sps:$4 sm:$0xff]   ;;  %3579 = vst [vmem:[#allocation41_spill] sm:$0xff] %v3218_v13 }
  0x7a   :  { %3566 = vst [vmem:[#allocation28_spill] sm:$0xff] %v3178_v14  ;;  %3567 = vst [vmem:[#allocation29_spill] sm:$0xff] %v3182_v46  ;;  %v57_v12 = vld [vmem:[#allocation2 + $0x18] sm:$0xff] }
  0x7b   :  { %v3224_v60 = vpack.c.bf16 %v57_v12, %v57_v12 }
  0x7c   :  { %1014 = vmatpush1.bf16.msra.mxu0 %v3158_v52  ;;  %1096 = vmatpush1.bf16.msra.mxu1 %v3160_v54  ;;  %v3184_v52 = vld [vmem:[#allocation5 + $0x268] ss:$16 sps:$4 sm:$0xff]   ;;  %v3188_v54 = vld [vmem:[#allocation5 + $0x284] ss:$16 sps:$4 sm:$0xff]  }
  0x7d   :  { %1015 = vmatprep.subr.bf16.mxu0 %v3164_v56  ;;  %1097 = vmatprep.subr.bf16.mxu1 %v3166_v59  ;;  %3568 = vst [vmem:[#allocation30_spill] sm:$0xff] %v3184_v52  ;;  %3569 = vst [vmem:[#allocation31_spill] sm:$0xff] %v3188_v54  ;;  %v3190_v56 = vld [vmem:[#allocation5 + $0x28c] ss:$16 sps:$4 sm:$0xff]   ;;  %v3194_v59 = vld [vmem:[#allocation5 + $0x280] ss:$16 sps:$4 sm:$0xff]  }
  0x7e   :  { %3570 = vst [vmem:[#allocation32_spill] sm:$0xff] %v3190_v56  ;;  %3571 = vst [vmem:[#allocation33_spill] sm:$0xff] %v3194_v59 }
  0x7f   :  { %3582 = vst [vmem:[#allocation44_spill] sm:$0xff] %v3224_v60 }
  0x80   :  { %1016 = vmatpush1.bf16.msra.mxu0 %v3170_v1  ;;  %1098 = vmatpush1.bf16.msra.mxu1 %v3172_v6  ;;  %v3196_v1 = vld [vmem:[#allocation5 + $0x288] ss:$16 sps:$4 sm:$0xff]   ;;  %v3200_v6 = vld [vmem:[#allocation5 + $0x2a4] ss:$16 sps:$4 sm:$0xff]  }
  0x81   :  { %1017 = vmatprep.subr.bf16.mxu0 %v3176_v11  ;;  %1099 = vmatprep.subr.bf16.mxu1 %v3178_v14  ;;  %3572 = vst [vmem:[#allocation34_spill] sm:$0xff] %v3196_v1  ;;  %3573 = vst [vmem:[#allocation35_spill] sm:$0xff] %v3200_v6  ;;  %v3202_v11 = vld [vmem:[#allocation5 + $0x2ac] ss:$16 sps:$4 sm:$0xff]   ;;  %v3206_v14 = vld [vmem:[#allocation5 + $0x2a0] ss:$16 sps:$4 sm:$0xff]  }
  0x82   :  { %3574 = vst [vmem:[#allocation36_spill] sm:$0xff] %v3202_v11  ;;  %3575 = vst [vmem:[#allocation37_spill] sm:$0xff] %v3206_v14 }
  0x84   :  { %1018 = vmatpush1.bf16.msra.mxu0 %v3182_v46  ;;  %1100 = vmatpush1.bf16.msra.mxu1 %v3184_v52  ;;  %v3208_v46 = vld [vmem:[#allocation5 + $0x2a8] ss:$16 sps:$4 sm:$0xff]   ;;  %v3212_v52 = vld [vmem:[#allocation5 + $0x2c4] ss:$16 sps:$4 sm:$0xff]  }
  0x85   :  { %1019 = vmatprep.subr.bf16.mxu0 %v3188_v54  ;;  %1101 = vmatprep.subr.bf16.mxu1 %v3190_v56  ;;  %3576 = vst [vmem:[#allocation38_spill] sm:$0xff] %v3208_v46  ;;  %3577 = vst [vmem:[#allocation39_spill] sm:$0xff] %v3212_v52  ;;  %v3214_v54 = vld [vmem:[#allocation5 + $0x2cc] ss:$16 sps:$4 sm:$0xff]   ;;  %v3216_v56 = vld [vmem:[#allocation5 + $0x2c0] ss:$16 sps:$4 sm:$0xff]  }
  0x86   :  { %3578 = vst [vmem:[#allocation40_spill] sm:$0xff] %v3214_v54 }
  0x88   :  { %1020 = vmatpush1.bf16.msra.mxu0 %v3194_v59  ;;  %1102 = vmatpush1.bf16.msra.mxu1 %v3196_v1  ;;  %v3220_v59 = vld [vmem:[#allocation5 + $0x2e4] ss:$16 sps:$4 sm:$0xff]   ;;  %v3222_v1 = vld [vmem:[#allocation5 + $0x2ec] ss:$16 sps:$4 sm:$0xff]  }
  0x89   :  { %1021 = vmatprep.subr.bf16.mxu0 %v3200_v6  ;;  %1103 = vmatprep.subr.bf16.mxu1 %v3202_v11  ;;  %3580 = vst [vmem:[#allocation42_spill] sm:$0xff] %v3220_v59  ;;  %3581 = vst [vmem:[#allocation43_spill] sm:$0xff] %v3222_v1  ;;  %v65_v11 = vunpack.c.l.bf16 %v3224_v60  ;;  %v3231_v6 = vld [vmem:[#allocation5 + $0x2e0] ss:$16 sps:$4 sm:$0xff]   ;;  %v3249_v60 = vld [vmem:[#allocation5 + $0x32c] ss:$16 sps:$4 sm:$0xff]  }
  0x8a   :  { %3583 = vst [vmem:[#allocation45_spill] sm:$0xff] %v3231_v6  ;;  %3590 = vst [vmem:[#allocation52_spill] sm:$0xff] %v3249_v60 }
  0x8b   :  { %v69_v7 = vsub.f32 %v57_v12, %v65_v11  ;;  %v3255_v12 = vld [vmem:[#allocation5 + $0x320] ss:$16 sps:$4 sm:$0xff]   ;;  %v3259_v11 = vld [vmem:[#allocation5 + $0x344] ss:$16 sps:$4 sm:$0xff]  }
  0x8c   :  { %1022 = vmatpush1.bf16.msra.mxu0 %v3206_v14  ;;  %1104 = vmatpush1.bf16.msra.mxu1 %v3208_v46  ;;  %v3245_v46 = vld [vmem:[#allocation5 + $0x308] ss:$16 sps:$4 sm:$0xff]   ;;  %v3247_v14 = vld [vmem:[#allocation5 + $0x324] ss:$16 sps:$4 sm:$0xff]   ;;  %3591 = vst [vmem:[#allocation53_spill] sm:$0xff] %v3255_v12  ;;  %3593 = vst [vmem:[#allocation55_spill] sm:$0xff] %v3259_v11 }
  0x8d   :  { %1023 = vmatprep.subr.bf16.mxu0 %v3212_v52  ;;  %1105 = vmatprep.subr.bf16.mxu1 %v3214_v54  ;;  %v73_v54 = vpack.c.bf16 %v69_v7, %v69_v7  ;;  %v3243_v52 = vld [vmem:[#allocation5 + $0x300] ss:$16 sps:$4 sm:$0xff]   ;;  %3588 = vst [vmem:[#allocation50_spill] sm:$0xff] %v3245_v46  ;;  %3589 = vst [vmem:[#allocation51_spill] sm:$0xff] %v3247_v14  ;;  %v3257_v7 = vld [vmem:[#allocation5 + $0x328] ss:$16 sps:$4 sm:$0xff]  }
  0x8e   :  { %3587 = vst [vmem:[#allocation49_spill] sm:$0xff] %v3243_v52  ;;  %3592 = vst [vmem:[#allocation54_spill] sm:$0xff] %v3257_v7 }
  0x8f   :  { %1043 = vmatprep.mubr.bf16.mxu0 %v73_v54  ;;  %1125 = vmatprep.mubr.bf16.mxu1 %v73_v54  ;;  %v3267_v54 = vld [vmem:[#allocation5 + $0x340] ss:$16 sps:$4 sm:$0xff]  }
  0x90   :  { %1024 = vmatpush1.bf16.msra.mxu0 %v3216_v56  ;;  %1106 = vmatpush1.bf16.msra.mxu1 %v3218_v13  ;;  %3595 = vst [vmem:[#allocation57_spill] sm:$0xff] %v3267_v54 }
  0x91   :  { %1025 = vmatprep.subr.bf16.mxu0 %v3220_v59  ;;  %1107 = vmatprep.subr.bf16.mxu1 %v3222_v1  ;;  %v3261_v1 = vld [vmem:[#allocation5 + $0x34c] ss:$16 sps:$4 sm:$0xff]  }
  0x92   :  { %3594 = vst [vmem:[#allocation56_spill] sm:$0xff] %v3261_v1 }
  0x94   :  { %1026 = vmatpush1.bf16.msra.mxu0 %v3231_v6  ;;  %1108 = vmatpush1.bf16.msra.mxu1 %v3233_v10  ;;  %v3273_v10 = vld [vmem:[#allocation5 + $0x36c] ss:$16 sps:$4 sm:$0xff]  }
  0x95   :  { %1027 = vmatprep.subr.bf16.mxu0 %v3235_v9  ;;  %1109 = vmatprep.subr.bf16.mxu1 %v3237_v8  ;;  %v3269_v9 = vld [vmem:[#allocation5 + $0x348] ss:$16 sps:$4 sm:$0xff]   ;;  %v3271_v8 = vld [vmem:[#allocation5 + $0x364] ss:$16 sps:$4 sm:$0xff]   ;;  %3598 = vst [vmem:[#allocation60_spill] sm:$0xff] %v3273_v10 }
  0x96   :  { %3596 = vst [vmem:[#allocation58_spill] sm:$0xff] %v3269_v9  ;;  %3597 = vst [vmem:[#allocation59_spill] sm:$0xff] %v3271_v8  ;;  %v3297_v6 = vld [vmem:[#allocation5 + $0x3ac] ss:$16 sps:$4 sm:$0xff]  }
  0x97   :  { %3605 = vst [vmem:[#allocation67_spill] sm:$0xff] %v3297_v6 }
  0x98   :  { %1028 = vmatpush1.bf16.msra.mxu0 %v3243_v52  ;;  %1110 = vmatpush1.bf16.msra.mxu1 %v3245_v46  ;;  %v3279_v46 = vld [vmem:[#allocation5 + $0x360] ss:$16 sps:$4 sm:$0xff]   ;;  %v3285_v52 = vld [vmem:[#allocation5 + $0x38c] ss:$16 sps:$4 sm:$0xff]  }
  0x99   :  { %1029 = vmatprep.subr.bf16.mxu0 %v3247_v14  ;;  %1111 = vmatprep.subr.bf16.mxu1 %v3249_v60  ;;  %3599 = vst [vmem:[#allocation61_spill] sm:$0xff] %v3279_v46  ;;  %v3281_v14 = vld [vmem:[#allocation5 + $0x368] ss:$16 sps:$4 sm:$0xff]   ;;  %v3283_v60 = vld [vmem:[#allocation5 + $0x384] ss:$16 sps:$4 sm:$0xff]   ;;  %3602 = vst [vmem:[#allocation64_spill] sm:$0xff] %v3285_v52 }
  0x9a   :  { %3600 = vst [vmem:[#allocation62_spill] sm:$0xff] %v3281_v14  ;;  %3601 = vst [vmem:[#allocation63_spill] sm:$0xff] %v3283_v60 }
  0x9c   :  { %1030 = vmatpush1.bf16.msra.mxu0 %v3255_v12  ;;  %1112 = vmatpush1.bf16.msra.mxu1 %v3257_v7  ;;  %v3291_v7 = vld [vmem:[#allocation5 + $0x380] ss:$16 sps:$4 sm:$0xff]   ;;  %v3295_v12 = vld [vmem:[#allocation5 + $0x3a4] ss:$16 sps:$4 sm:$0xff]  }
  0x9d   :  { %1031 = vmatprep.subr.bf16.mxu0 %v3259_v11  ;;  %1113 = vmatprep.subr.bf16.mxu1 %v3261_v1  ;;  %v3293_v11 = vld [vmem:[#allocation5 + $0x388] ss:$16 sps:$4 sm:$0xff]   ;;  %v56_v1 = vld [vmem:[#allocation2 + $0x10] sm:$0xff]  ;;  %3604 = vst [vmem:[#allocation66_spill] sm:$0xff] %v3295_v12 }
  0x9e   :  { %3603 = vst [vmem:[#allocation65_spill] sm:$0xff] %v3293_v11  ;;  %v3311_v59 = vpack.c.bf16 %v56_v1, %v56_v1 }
  0xa0   :  { %1032 = vmatpush1.bf16.msra.mxu0 %v3267_v54  ;;  %1114 = vmatpush1.bf16.msra.mxu1 %v3269_v9  ;;  %v3307_v9 = vld [vmem:[#allocation5 + $0x3c4] ss:$16 sps:$4 sm:$0xff]   ;;  %v3309_v54 = vld [vmem:[#allocation5 + $0x3cc] ss:$16 sps:$4 sm:$0xff]   ;;  %3608 = vst [vmem:[#allocation70_spill] sm:$0xff] %v3311_v59  ;;  %v64_v13 = vunpack.c.l.bf16 %v3311_v59 }
  0xa1   :  { %1033 = vmatprep.subr.bf16.mxu0 %v3271_v8  ;;  %1115 = vmatprep.subr.bf16.mxu1 %v3273_v10  ;;  %v3303_v8 = vld [vmem:[#allocation5 + $0x3a0] ss:$16 sps:$4 sm:$0xff]   ;;  %v3305_v10 = vld [vmem:[#allocation5 + $0x3a8] ss:$16 sps:$4 sm:$0xff]   ;;  %3606 = vst [vmem:[#allocation68_spill] sm:$0xff] %v3307_v9  ;;  %3607 = vst [vmem:[#allocation69_spill] sm:$0xff] %v3309_v54 }
  0xa4   :  { %1034 = vmatpush1.bf16.msra.mxu0 %v3279_v46  ;;  %1116 = vmatpush1.bf16.msra.mxu1 %v3281_v14  ;;  %v3321_v14 = vld [vmem:[#allocation5 + $0x3e4] ss:$16 sps:$4 sm:$0xff]   ;;  %v3323_v46 = vld [vmem:[#allocation5 + $0x3ec] ss:$16 sps:$4 sm:$0xff]  }
  0xa5   :  { %1035 = vmatprep.subr.bf16.mxu0 %v3283_v60  ;;  %1117 = vmatprep.subr.bf16.mxu1 %v3285_v52  ;;  %v3317_v60 = vld [vmem:[#allocation5 + $0x3c0] ss:$16 sps:$4 sm:$0xff]   ;;  %v3319_v52 = vld [vmem:[#allocation5 + $0x3c8] ss:$16 sps:$4 sm:$0xff]   ;;  %3610 = vst [vmem:[#allocation72_spill] sm:$0xff] %v3321_v14 }
  0xa6   :  { %3609 = vst [vmem:[#allocation71_spill] sm:$0xff] %v3319_v52 }
  0xa8   :  { %1036 = vmatpush1.bf16.msra.mxu0 %v3291_v7  ;;  %1118 = vmatpush1.bf16.msra.mxu1 %v3293_v11  ;;  %v68_v11 = vsub.f32 %v56_v1, %v64_v13  ;;  %v2814_v13 = vld [vmem:[#allocation5] ss:$16 sps:$4 sm:$0xff]   ;;  %v2815_v1 = vld [vmem:[#allocation5 + $0x8] ss:$16 sps:$4 sm:$0xff]  }
  0xa9   :  { %1037 = vmatprep.subr.bf16.mxu0 %v3295_v12  ;;  %1119 = vmatprep.subr.bf16.mxu1 %v3297_v6  ;;  %v3330_v12 = vld [vmem:[#allocation5 + $0x3e0] ss:$16 sps:$4 sm:$0xff]   ;;  %v3332_v6 = vld [vmem:[#allocation5 + $0x3e8] ss:$16 sps:$4 sm:$0xff]  }
  0xaa   :  { %3611 = vst [vmem:[#allocation73_spill] sm:$0xff] %v3332_v6  ;;  %v72_v59 = vpack.c.bf16 %v68_v11, %v68_v11  ;;  %v2818_v11 = vld [vmem:[#allocation5 + $0x20] ss:$16 sps:$4 sm:$0xff]  }
  0xac   :  { %1038 = vmatpush1.bf16.msra.mxu0 %v3303_v8  ;;  %1120 = vmatpush1.bf16.msra.mxu1 %v3305_v10 }
  0xad   :  { %1039 = vmatprep.subr.bf16.mxu0 %v3307_v9  ;;  %1121 = vmatprep.subr.bf16.mxu1 %v3309_v54  ;;  %v2812_v9 = vld [vmem:[#allocation5 + $0x4] ss:$16 sps:$4 sm:$0xff]   ;;  %v2813_v54 = vld [vmem:[#allocation5 + $0xc] ss:$16 sps:$4 sm:$0xff]  }
  0xb0   :  { %1040 = vmatpush1.bf16.msra.mxu0 %v3317_v60  ;;  %1122 = vmatpush1.bf16.msra.mxu1 %v3319_v52  ;;  %v2816_v52 = vld [vmem:[#allocation5 + $0x24] ss:$16 sps:$4 sm:$0xff]  }
  0xb1   :  { %1041 = vmatprep.subr.bf16.mxu0 %v3321_v14  ;;  %1123 = vmatprep.subr.bf16.mxu1 %v3323_v46  ;;  %v2817_v14 = vld [vmem:[#allocation5 + $0x2c] ss:$16 sps:$4 sm:$0xff]  }
  0xb4   :  { %1042 = vmatpush1.bf16.msra.mxu0 %v3330_v12  ;;  %1124 = vmatpush1.bf16.msra.mxu1 %v3332_v6  ;;  %v2819_v6 = vld [vmem:[#allocation5 + $0x28] ss:$16 sps:$4 sm:$0xff]  }
  0xb5   :  { %1134 = vmatprep.subr.bf16.mxu0 %v2812_v9  ;;  %1216 = vmatprep.subr.bf16.mxu1 %v2813_v54  ;;  %v2820_v9 = vld [vmem:[#allocation5 + $0x44] ss:$16 sps:$4 sm:$0xff]   ;;  %v2821_v54 = vld [vmem:[#allocation5 + $0x4c] ss:$16 sps:$4 sm:$0xff]  }
  0xb7   :  { %1044 = vmatmul.mubr.bf16.vlgmr.msra.gmra.mrb[0].mxu0 %v72_v59  ;;  %1126 = vmatmul.mubr.bf16.vlgmr.msra.gmra.mrb[0].mxu1 %v72_v59  ;;  %v2822_v59 = vld [vmem:[#allocation5 + $0x40] ss:$16 sps:$4 sm:$0xff]  }
  0xb8   :  { %1135 = vmatpush1.bf16.msra.mxu0 %v2814_v13  ;;  %1217 = vmatpush1.bf16.msra.mxu1 %v2815_v1  ;;  %v2823_v13 = vld [vmem:[#allocation5 + $0x48] ss:$16 sps:$4 sm:$0xff]   ;;  %v2824_v1 = vld [vmem:[#allocation5 + $0x64] ss:$16 sps:$4 sm:$0xff]  }
  0xb9   :  { %1136 = vmatprep.subr.bf16.mxu0 %v2816_v52  ;;  %1218 = vmatprep.subr.bf16.mxu1 %v2817_v14  ;;  %v2825_v52 = vld [vmem:[#allocation5 + $0x6c] ss:$16 sps:$4 sm:$0xff]   ;;  %v2826_v14 = vld [vmem:[#allocation5 + $0x60] ss:$16 sps:$4 sm:$0xff]  }
  0xba   :  { %1166 = vmatprep.mubr.bf16.mxu0 %v3080_v48  ;;  %1248 = vmatprep.mubr.bf16.mxu1 %v3080_v48 }
  0xbc   :  { %1137 = vmatpush1.bf16.msra.mxu0 %v2818_v11  ;;  %1219 = vmatpush1.bf16.msra.mxu1 %v2819_v6  ;;  %v3660_v6 = vld [vmem:[#allocation60_spill] sm:$0xff]  ;;  %v3661_v11 = vld [vmem:[#allocation61_spill] sm:$0xff] }
  0xbd   :  { %1138 = vmatprep.subr.bf16.mxu0 %v2820_v9  ;;  %1220 = vmatprep.subr.bf16.mxu1 %v2821_v54  ;;  %v3662_v9 = vld [vmem:[#allocation62_spill] sm:$0xff]  ;;  %v3663_v54 = vld [vmem:[#allocation63_spill] sm:$0xff] }
  0xc0   :  { %1139 = vmatpush1.bf16.msra.mxu0 %v2822_v59  ;;  %1221 = vmatpush1.bf16.msra.mxu1 %v2823_v13  ;;  %v3664_v59 = vld [vmem:[#allocation64_spill] sm:$0xff]  ;;  %v3665_v13 = vld [vmem:[#allocation65_spill] sm:$0xff] }
  0xc1   :  { %1140 = vmatprep.subr.bf16.mxu0 %v2824_v1  ;;  %1222 = vmatprep.subr.bf16.mxu1 %v2825_v52  ;;  %v3666_v1 = vld [vmem:[#allocation66_spill] sm:$0xff]  ;;  %v3667_v52 = vld [vmem:[#allocation67_spill] sm:$0xff] }
  0xc4   :  { %1141 = vmatpush1.bf16.msra.mxu0 %v2826_v14  ;;  %1223 = vmatpush1.bf16.msra.mxu1 %v2989_v15  ;;  %v3612_v15 = vld [vmem:[#allocation13_spill] sm:$0xff]  ;;  %v3668_v14 = vld [vmem:[#allocation68_spill] sm:$0xff] }
  0xc5   :  { %1142 = vmatprep.subr.bf16.mxu0 %v2991_v16  ;;  %1224 = vmatprep.subr.bf16.mxu1 %v2993_v17  ;;  %v3613_v16 = vld [vmem:[#allocation14_spill] sm:$0xff]  ;;  %v3614_v17 = vld [vmem:[#allocation15_spill] sm:$0xff] }
  0xc8   :  { %1143 = vmatpush1.bf16.msra.mxu0 %v2995_v18  ;;  %1225 = vmatpush1.bf16.msra.mxu1 %v2997_v19  ;;  %v3615_v18 = vld [vmem:[#allocation16_spill] sm:$0xff] }
  0xc9   :  { %1144 = vmatprep.subr.bf16.mxu0 %v3000_v20  ;;  %1226 = vmatprep.subr.bf16.mxu1 %v3004_v21  ;;  %v3616_v19 = vld [vmem:[#allocation12_spill] sm:$0xff]  ;;  %v3617_v20 = vld [vmem:[#allocation17_spill] sm:$0xff]  ;;  %v3618_v21 = vld [vmem:[#allocation18_spill] sm:$0xff] }
  0xcc   :  { %1145 = vmatpush1.bf16.msra.mxu0 %v3006_v22  ;;  %1227 = vmatpush1.bf16.msra.mxu1 %v3010_v23  ;;  %v3619_v22 = vld [vmem:[#allocation19_spill] sm:$0xff]  ;;  %v3620_v23 = vld [vmem:[#allocation20_spill] sm:$0xff] }
  0xcd   :  { %1146 = vmatprep.subr.bf16.mxu0 %v3012_v24  ;;  %1228 = vmatprep.subr.bf16.mxu1 %v3016_v25  ;;  %v3621_v24 = vld [vmem:[#allocation44_spill] sm:$0xff]  ;;  %v3622_v25 = vld [vmem:[#allocation21_spill] sm:$0xff] }
  0xd0   :  { %1147 = vmatpush1.bf16.msra.mxu0 %v3018_v26  ;;  %1229 = vmatpush1.bf16.msra.mxu1 %v3020_v27  ;;  %v3623_v26 = vld [vmem:[#allocation22_spill] sm:$0xff]  ;;  %v3624_v27 = vld [vmem:[#allocation23_spill] sm:$0xff] }
  0xd1   :  { %1148 = vmatprep.subr.bf16.mxu0 %v3024_v28  ;;  %1230 = vmatprep.subr.bf16.mxu1 %v3028_v29  ;;  %v3625_v28 = vld [vmem:[#allocation24_spill] sm:$0xff]  ;;  %v3626_v29 = vld [vmem:[#allocation25_spill] sm:$0xff] }
  0xd4   :  { %1149 = vmatpush1.bf16.msra.mxu0 %v3030_v30  ;;  %1231 = vmatpush1.bf16.msra.mxu1 %v3034_v31  ;;  %v3627_v30 = vld [vmem:[#allocation26_spill] sm:$0xff]  ;;  %v3628_v31 = vld [vmem:[#allocation27_spill] sm:$0xff] }
  0xd5   :  { %1150 = vmatprep.subr.bf16.mxu0 %v3036_v32  ;;  %1232 = vmatprep.subr.bf16.mxu1 %v3040_v33  ;;  %v3629_v32 = vld [vmem:[#allocation28_spill] sm:$0xff]  ;;  %v3630_v33 = vld [vmem:[#allocation29_spill] sm:$0xff] }
  0xd8   :  { %1151 = vmatpush1.bf16.msra.mxu0 %v3042_v34  ;;  %1233 = vmatpush1.bf16.msra.mxu1 %v3044_v35  ;;  %v3631_v34 = vld [vmem:[#allocation30_spill] sm:$0xff]  ;;  %v3632_v35 = vld [vmem:[#allocation31_spill] sm:$0xff] }
  0xd9   :  { %1152 = vmatprep.subr.bf16.mxu0 %v3048_v36  ;;  %1234 = vmatprep.subr.bf16.mxu1 %v3052_v37  ;;  %v3633_v36 = vld [vmem:[#allocation32_spill] sm:$0xff]  ;;  %v3634_v37 = vld [vmem:[#allocation33_spill] sm:$0xff] }
  0xdc   :  { %1153 = vmatpush1.bf16.msra.mxu0 %v3054_v38  ;;  %1235 = vmatpush1.bf16.msra.mxu1 %v3058_v39  ;;  %v3635_v38 = vld [vmem:[#allocation34_spill] sm:$0xff]  ;;  %v3636_v39 = vld [vmem:[#allocation35_spill] sm:$0xff] }
  0xdd   :  { %1154 = vmatprep.subr.bf16.mxu0 %v3060_v40  ;;  %1236 = vmatprep.subr.bf16.mxu1 %v3064_v41  ;;  %v3637_v40 = vld [vmem:[#allocation36_spill] sm:$0xff]  ;;  %v3638_v41 = vld [vmem:[#allocation37_spill] sm:$0xff] }
  0xe0   :  { %1155 = vmatpush1.bf16.msra.mxu0 %v3066_v42  ;;  %1237 = vmatpush1.bf16.msra.mxu1 %v3068_v43  ;;  %v3639_v42 = vld [vmem:[#allocation38_spill] sm:$0xff]  ;;  %v3640_v43 = vld [vmem:[#allocation39_spill] sm:$0xff] }
  0xe1   :  { %1156 = vmatprep.subr.bf16.mxu0 %v3072_v44  ;;  %1238 = vmatprep.subr.bf16.mxu1 %v3076_v45  ;;  %v3641_v44 = vld [vmem:[#allocation40_spill] sm:$0xff]  ;;  %v3642_v45 = vld [vmem:[#allocation41_spill] sm:$0xff] }
  0xe4   :  { %1157 = vmatpush1.bf16.msra.mxu0 %v3078_v47  ;;  %1239 = vmatpush1.bf16.msra.mxu1 %v3084_v49  ;;  %v3643_v47 = vld [vmem:[#allocation42_spill] sm:$0xff]  ;;  %v3644_v49 = vld [vmem:[#allocation43_spill] sm:$0xff] }
  0xe5   :  { %1158 = vmatprep.subr.bf16.mxu0 %v3088_v50  ;;  %1240 = vmatprep.subr.bf16.mxu1 %v3090_v51  ;;  %v3645_v50 = vld [vmem:[#allocation45_spill] sm:$0xff]  ;;  %v3646_v51 = vld [vmem:[#allocation46_spill] sm:$0xff] }
  0xe8   :  { %1159 = vmatpush1.bf16.msra.mxu0 %v3093_v53  ;;  %1241 = vmatpush1.bf16.msra.mxu1 %v3097_v55  ;;  %v3647_v53 = vld [vmem:[#allocation47_spill] sm:$0xff]  ;;  %v3648_v55 = vld [vmem:[#allocation48_spill] sm:$0xff] }
  0xe9   :  { %1160 = vmatprep.subr.bf16.mxu0 %v3101_v57  ;;  %1242 = vmatprep.subr.bf16.mxu1 %v3103_v58  ;;  %v3649_v57 = vld [vmem:[#allocation49_spill] sm:$0xff]  ;;  %v3650_v58 = vld [vmem:[#allocation50_spill] sm:$0xff] }
  0xec   :  { %1161 = vmatpush1.bf16.msra.mxu0 %v3109_v61  ;;  %1243 = vmatpush1.bf16.msra.mxu1 %v3111_v62  ;;  %v3651_v61 = vld [vmem:[#allocation51_spill] sm:$0xff]  ;;  %v3652_v62 = vld [vmem:[#allocation52_spill] sm:$0xff] }
  0xed   :  { %1162 = vmatprep.subr.bf16.mxu0 %v3115_v63  ;;  %1244 = vmatprep.subr.bf16.mxu1 %v3117_v0  ;;  %v3653_v63 = vld [vmem:[#allocation53_spill] sm:$0xff]  ;;  %v3654_v0 = vld [vmem:[#allocation54_spill] sm:$0xff] }
  0xf0   :  { %1163 = vmatpush1.bf16.msra.mxu0 %v3122_v2  ;;  %1245 = vmatpush1.bf16.msra.mxu1 %v3124_v3  ;;  %v3655_v2 = vld [vmem:[#allocation55_spill] sm:$0xff]  ;;  %v3656_v3 = vld [vmem:[#allocation56_spill] sm:$0xff] }
  0xf1   :  { %1164 = vmatprep.subr.bf16.mxu0 %v3128_v4  ;;  %1246 = vmatprep.subr.bf16.mxu1 %v3130_v5  ;;  %v3657_v4 = vld [vmem:[#allocation57_spill] sm:$0xff]  ;;  %v3658_v5 = vld [vmem:[#allocation58_spill] sm:$0xff] }
  0xf4   :  { %1165 = vmatpush1.bf16.msra.mxu0 %v3612_v15  ;;  %1247 = vmatpush1.bf16.msra.mxu1 %v3613_v16  ;;  %v3669_v15 = vld [vmem:[#allocation69_spill] sm:$0xff]  ;;  %v3670_v16 = vld [vmem:[#allocation71_spill] sm:$0xff] }
  0xf5   :  { %1175 = vmatprep.subr.bf16.mxu0 %v3614_v17  ;;  %1257 = vmatprep.subr.bf16.mxu1 %v3615_v18  ;;  %v3671_v17 = vld [vmem:[#allocation72_spill] sm:$0xff]  ;;  %v2625_v18 = vld [vmem:[#allocation7 + $0xc] ss:$16 sps:$4 sm:$0xff]  }
  0xf7   :  { %1167 = vmatmul.mubr.bf16.vlgmr.msra.gmra.mrb[0].mxu0 %v3616_v19  ;;  %1249 = vmatmul.mubr.bf16.vlgmr.msra.gmra.mrb[0].mxu1 %v3616_v19 }
  0xf8   :  { %1176 = vmatpush1.bf16.msra.mxu0 %v3617_v20  ;;  %1258 = vmatpush1.bf16.msra.mxu1 %v3618_v21  ;;  %v3672_v20 = vld [vmem:[#allocation73_spill] sm:$0xff]  ;;  %v2628_v21 = vld [vmem:[#allocation7 + $0x24] ss:$16 sps:$4 sm:$0xff]  }
  0xf9   :  { %1177 = vmatprep.subr.bf16.mxu0 %v3619_v22  ;;  %1259 = vmatprep.subr.bf16.mxu1 %v3620_v23  ;;  %v2631_v22 = vld [vmem:[#allocation7 + $0x2c] ss:$16 sps:$4 sm:$0xff]   ;;  %v3673_v23 = vld [vmem:[#allocation70_spill] sm:$0xff] }
  0xfa   :  { %1207 = vmatprep.mubr.bf16.mxu0 %v3621_v24  ;;  %1289 = vmatprep.mubr.bf16.mxu1 %v3621_v24 }
  0xfc   :  { %1178 = vmatpush1.bf16.msra.mxu0 %v3622_v25  ;;  %1260 = vmatpush1.bf16.msra.mxu1 %v3623_v26  ;;  %v2634_v25 = vld [vmem:[#allocation7 + $0x44] ss:$16 sps:$4 sm:$0xff]   ;;  %v2632_v26 = vld [vmem:[#allocation7 + $0x40] ss:$16 sps:$4 sm:$0xff]  }
  0xfd   :  { %1179 = vmatprep.subr.bf16.mxu0 %v3624_v27  ;;  %1261 = vmatprep.subr.bf16.mxu1 %v3625_v28  ;;  %v2635_v27 = vld [vmem:[#allocation7 + $0x48] ss:$16 sps:$4 sm:$0xff]   ;;  %v2640_v28 = vld [vmem:[#allocation7 + $0x64] ss:$16 sps:$4 sm:$0xff]  }
 0x100   :  { %1180 = vmatpush1.bf16.msra.mxu0 %v3626_v29  ;;  %1262 = vmatpush1.bf16.msra.mxu1 %v3627_v30  ;;  %v2643_v29 = vld [vmem:[#allocation7 + $0x6c] ss:$16 sps:$4 sm:$0xff]   ;;  %v2638_v30 = vld [vmem:[#allocation7 + $0x60] ss:$16 sps:$4 sm:$0xff]  }
 0x101   :  { %1181 = vmatprep.subr.bf16.mxu0 %v3628_v31  ;;  %1263 = vmatprep.subr.bf16.mxu1 %v3629_v32  ;;  %v2641_v31 = vld [vmem:[#allocation7 + $0x68] ss:$16 sps:$4 sm:$0xff]   ;;  %v2646_v32 = vld [vmem:[#allocation7 + $0x84] ss:$16 sps:$4 sm:$0xff]  }
 0x104   :  { %1182 = vmatpush1.bf16.msra.mxu0 %v3630_v33  ;;  %1264 = vmatpush1.bf16.msra.mxu1 %v3631_v34  ;;  %v2649_v33 = vld [vmem:[#allocation7 + $0x8c] ss:$16 sps:$4 sm:$0xff]   ;;  %v2644_v34 = vld [vmem:[#allocation7 + $0x80] ss:$16 sps:$4 sm:$0xff]  }
 0x105   :  { %1183 = vmatprep.subr.bf16.mxu0 %v3632_v35  ;;  %1265 = vmatprep.subr.bf16.mxu1 %v3633_v36  ;;  %v2652_v35 = vld [vmem:[#allocation7 + $0xa4] ss:$16 sps:$4 sm:$0xff]   ;;  %v2655_v36 = vld [vmem:[#allocation7 + $0xac] ss:$16 sps:$4 sm:$0xff]  }
 0x108   :  { %1184 = vmatpush1.bf16.msra.mxu0 %v3634_v37  ;;  %1266 = vmatpush1.bf16.msra.mxu1 %v3635_v38  ;;  %v2650_v37 = vld [vmem:[#allocation7 + $0xa0] ss:$16 sps:$4 sm:$0xff]   ;;  %v2653_v38 = vld [vmem:[#allocation7 + $0xa8] ss:$16 sps:$4 sm:$0xff]  }
 0x109   :  { %1185 = vmatprep.subr.bf16.mxu0 %v3636_v39  ;;  %1267 = vmatprep.subr.bf16.mxu1 %v3637_v40  ;;  %v2658_v39 = vld [vmem:[#allocation7 + $0xc4] ss:$16 sps:$4 sm:$0xff]   ;;  %v2661_v40 = vld [vmem:[#allocation7 + $0xcc] ss:$16 sps:$4 sm:$0xff]  }
 0x10c   :  { %1186 = vmatpush1.bf16.msra.mxu0 %v3638_v41  ;;  %1268 = vmatpush1.bf16.msra.mxu1 %v3639_v42  ;;  %v2656_v41 = vld [vmem:[#allocation7 + $0xc0] ss:$16 sps:$4 sm:$0xff]   ;;  %v2659_v42 = vld [vmem:[#allocation7 + $0xc8] ss:$16 sps:$4 sm:$0xff]  }
 0x10d   :  { %1187 = vmatprep.subr.bf16.mxu0 %v3640_v43  ;;  %1269 = vmatprep.subr.bf16.mxu1 %v3641_v44  ;;  %v2664_v43 = vld [vmem:[#allocation7 + $0xe4] ss:$16 sps:$4 sm:$0xff]   ;;  %v2667_v44 = vld [vmem:[#allocation7 + $0xec] ss:$16 sps:$4 sm:$0xff]  }
 0x110   :  { %1188 = vmatpush1.bf16.msra.mxu0 %v3216_v56  ;;  %1270 = vmatpush1.bf16.msra.mxu1 %v3642_v45  ;;  %v3659_v56 = vld [vmem:[#allocation59_spill] sm:$0xff]  ;;  %v2662_v45 = vld [vmem:[#allocation7 + $0xe0] ss:$16 sps:$4 sm:$0xff]  }
 0x111   :  { %1189 = vmatprep.subr.bf16.mxu0 %v3643_v47  ;;  %1271 = vmatprep.subr.bf16.mxu1 %v3644_v49  ;;  %v2665_v47 = vld [vmem:[#allocation7 + $0xe8] ss:$16 sps:$4 sm:$0xff]   ;;  %v2670_v49 = vld [vmem:[#allocation7 + $0x104] ss:$16 sps:$4 sm:$0xff]  }
 0x114   :  { %1190 = vmatpush1.bf16.msra.mxu0 %v3645_v50  ;;  %1272 = vmatpush1.bf16.msra.mxu1 %v3646_v51  ;;  %v2673_v50 = vld [vmem:[#allocation7 + $0x10c] ss:$16 sps:$4 sm:$0xff]   ;;  %v2668_v51 = vld [vmem:[#allocation7 + $0x100] ss:$16 sps:$4 sm:$0xff]  }
 0x115   :  { %1191 = vmatprep.subr.bf16.mxu0 %v3647_v53  ;;  %1273 = vmatprep.subr.bf16.mxu1 %v3648_v55  ;;  %v2671_v53 = vld [vmem:[#allocation7 + $0x108] ss:$16 sps:$4 sm:$0xff]   ;;  %v2676_v55 = vld [vmem:[#allocation7 + $0x124] ss:$16 sps:$4 sm:$0xff]  }
 0x118   :  { %1192 = vmatpush1.bf16.msra.mxu0 %v3649_v57  ;;  %1274 = vmatpush1.bf16.msra.mxu1 %v3650_v58  ;;  %v2679_v57 = vld [vmem:[#allocation7 + $0x12c] ss:$16 sps:$4 sm:$0xff]   ;;  %v2674_v58 = vld [vmem:[#allocation7 + $0x120] ss:$16 sps:$4 sm:$0xff]  }
 0x119   :  { %1193 = vmatprep.subr.bf16.mxu0 %v3651_v61  ;;  %1275 = vmatprep.subr.bf16.mxu1 %v3652_v62  ;;  %v2677_v61 = vld [vmem:[#allocation7 + $0x128] ss:$16 sps:$4 sm:$0xff]   ;;  %v2682_v62 = vld [vmem:[#allocation7 + $0x144] ss:$16 sps:$4 sm:$0xff]  }
 0x11c   :  { %1194 = vmatpush1.bf16.msra.mxu0 %v3653_v63  ;;  %1276 = vmatpush1.bf16.msra.mxu1 %v3654_v0  ;;  %v2685_v63 = vld [vmem:[#allocation7 + $0x14c] ss:$16 sps:$4 sm:$0xff]   ;;  %v2680_v0 = vld [vmem:[#allocation7 + $0x140] ss:$16 sps:$4 sm:$0xff]  }
 0x11d   :  { %1195 = vmatprep.subr.bf16.mxu0 %v3655_v2  ;;  %1277 = vmatprep.subr.bf16.mxu1 %v3656_v3  ;;  %v2683_v2 = vld [vmem:[#allocation7 + $0x148] ss:$16 sps:$4 sm:$0xff]   ;;  %v2688_v3 = vld [vmem:[#allocation7 + $0x164] ss:$16 sps:$4 sm:$0xff]  }
 0x120   :  { %1196 = vmatpush1.bf16.msra.mxu0 %v3657_v4  ;;  %1278 = vmatpush1.bf16.msra.mxu1 %v3658_v5  ;;  %v2691_v4 = vld [vmem:[#allocation7 + $0x16c] ss:$16 sps:$4 sm:$0xff]   ;;  %v2686_v5 = vld [vmem:[#allocation7 + $0x160] ss:$16 sps:$4 sm:$0xff]  }
 0x121   :  { %1197 = vmatprep.subr.bf16.mxu0 %v3659_v56  ;;  %1279 = vmatprep.subr.bf16.mxu1 %v3660_v6  ;;  %v2689_v56 = vld [vmem:[#allocation7 + $0x168] ss:$16 sps:$4 sm:$0xff]   ;;  %v2694_v6 = vld [vmem:[#allocation7 + $0x184] ss:$16 sps:$4 sm:$0xff]  }
 0x124   :  { %1198 = vmatpush1.bf16.msra.mxu0 %v3661_v11  ;;  %1280 = vmatpush1.bf16.msra.mxu1 %v3662_v9  ;;  %v2697_v11 = vld [vmem:[#allocation7 + $0x18c] ss:$16 sps:$4 sm:$0xff]   ;;  %v2692_v9 = vld [vmem:[#allocation7 + $0x180] ss:$16 sps:$4 sm:$0xff]  }
 0x125   :  { %1199 = vmatprep.subr.bf16.mxu0 %v3663_v54  ;;  %1281 = vmatprep.subr.bf16.mxu1 %v3664_v59  ;;  %v2695_v54 = vld [vmem:[#allocation7 + $0x188] ss:$16 sps:$4 sm:$0xff]   ;;  %v2700_v59 = vld [vmem:[#allocation7 + $0x1a4] ss:$16 sps:$4 sm:$0xff]  }
 0x128   :  { %1200 = vmatpush1.bf16.msra.mxu0 %v3291_v7  ;;  %1282 = vmatpush1.bf16.msra.mxu1 %v3665_v13  ;;  %v2622_v7 = vld [vmem:[#allocation7 + $0x4] ss:$16 sps:$4 sm:$0xff]   ;;  %v2703_v13 = vld [vmem:[#allocation7 + $0x1ac] ss:$16 sps:$4 sm:$0xff]  }
 0x129   :  { %1201 = vmatprep.subr.bf16.mxu0 %v3666_v1  ;;  %1283 = vmatprep.subr.bf16.mxu1 %v3667_v52  ;;  %v2698_v1 = vld [vmem:[#allocation7 + $0x1a0] ss:$16 sps:$4 sm:$0xff]   ;;  %v2701_v52 = vld [vmem:[#allocation7 + $0x1a8] ss:$16 sps:$4 sm:$0xff]  }
 0x12c   :  { %1202 = vmatpush1.bf16.msra.mxu0 %v3303_v8  ;;  %1284 = vmatpush1.bf16.msra.mxu1 %v3305_v10  ;;  %v2620_v8 = vld [vmem:[#allocation7] ss:$16 sps:$4 sm:$0xff]   ;;  %v2623_v10 = vld [vmem:[#allocation7 + $0x8] ss:$16 sps:$4 sm:$0xff]  }
 0x12d   :  { %1203 = vmatprep.subr.bf16.mxu0 %v3668_v14  ;;  %1285 = vmatprep.subr.bf16.mxu1 %v3669_v15  ;;  %v2706_v14 = vld [vmem:[#allocation7 + $0x1c4] ss:$16 sps:$4 sm:$0xff]   ;;  %v2709_v15 = vld [vmem:[#allocation7 + $0x1cc] ss:$16 sps:$4 sm:$0xff]  }
 0x130   :  { %1204 = vmatpush1.bf16.msra.mxu0 %v3317_v60  ;;  %1286 = vmatpush1.bf16.msra.mxu1 %v3670_v16  ;;  %v2626_v60 = vld [vmem:[#allocation7 + $0x20] ss:$16 sps:$4 sm:$0xff]  }
 0x131   :  { %1205 = vmatprep.subr.bf16.mxu0 %v3671_v17  ;;  %1287 = vmatprep.subr.bf16.mxu1 %v3323_v46  ;;  %v2629_v46 = vld [vmem:[#allocation7 + $0x28] ss:$16 sps:$4 sm:$0xff]   ;;  %v2704_v16 = vld [vmem:[#allocation7 + $0x1c0] ss:$16 sps:$4 sm:$0xff]  }
 0x132   :  { %v2707_v17 = vld [vmem:[#allocation7 + $0x1c8] ss:$16 sps:$4 sm:$0xff]  }
 0x134   :  { %1206 = vmatpush1.bf16.msra.mxu0 %v3330_v12  ;;  %1288 = vmatpush1.bf16.msra.mxu1 %v3672_v20  ;;  %v2637_v12 = vld [vmem:[#allocation7 + $0x4c] ss:$16 sps:$4 sm:$0xff]   ;;  %v2710_v20 = vld [vmem:[#allocation7 + $0x1e0] ss:$16 sps:$4 sm:$0xff]  }
 0x135   :  { %1938 = vmatprep.subr.bf16.mxu0 %v2622_v7  ;;  %2020 = vmatprep.subr.bf16.mxu1 %v2625_v18  ;;  %v2712_v7 = vld [vmem:[#allocation7 + $0x1e4] ss:$16 sps:$4 sm:$0xff]   ;;  %v2715_v18 = vld [vmem:[#allocation7 + $0x1ec] ss:$16 sps:$4 sm:$0xff]  }
 0x137   :  { %1208 = vmatmul.mubr.bf16.vlgmr.msra.gmra.mrb[0].mxu0 %v3673_v23  ;;  %1290 = vmatmul.mubr.bf16.vlgmr.msra.gmra.mrb[0].mxu1 %v3673_v23 }
 0x138   :  { %1939 = vmatpush1.bf16.msra.mxu0 %v2620_v8  ;;  %2021 = vmatpush1.bf16.msra.mxu1 %v2623_v10  ;;  %v2713_v8 = vld [vmem:[#allocation7 + $0x1e8] ss:$16 sps:$4 sm:$0xff]   ;;  %v2718_v10 = vld [vmem:[#allocation7 + $0x204] ss:$16 sps:$4 sm:$0xff]  }
 0x139   :  { %1940 = vmatprep.subr.bf16.mxu0 %v2628_v21  ;;  %2022 = vmatprep.subr.bf16.mxu1 %v2631_v22  ;;  %v2721_v21 = vld [vmem:[#allocation7 + $0x20c] ss:$16 sps:$4 sm:$0xff]   ;;  %v2716_v22 = vld [vmem:[#allocation7 + $0x200] ss:$16 sps:$4 sm:$0xff]  }
 0x13a   :  { %1970 = vmatprep.mubr.bf16.mxu0 %v3080_v48  ;;  %2052 = vmatprep.mubr.bf16.mxu1 %v3080_v48  ;;  %v2647_v48 = vld [vmem:[#allocation7 + $0x88] ss:$16 sps:$4 sm:$0xff]  }
 0x13c   :  { %1941 = vmatpush1.bf16.msra.mxu0 %v2626_v60  ;;  %2023 = vmatpush1.bf16.msra.mxu1 %v2629_v46  ;;  %v2719_v60 = vld [vmem:[#allocation7 + $0x208] ss:$16 sps:$4 sm:$0xff]   ;;  %v2724_v46 = vld [vmem:[#allocation7 + $0x224] ss:$16 sps:$4 sm:$0xff]  }
 0x13d   :  { %1942 = vmatprep.subr.bf16.mxu0 %v2634_v25  ;;  %2024 = vmatprep.subr.bf16.mxu1 %v2637_v12  ;;  %v2727_v25 = vld [vmem:[#allocation7 + $0x22c] ss:$16 sps:$4 sm:$0xff]   ;;  %v2722_v12 = vld [vmem:[#allocation7 + $0x220] ss:$16 sps:$4 sm:$0xff]  }
 0x140   :  { %1943 = vmatpush1.bf16.msra.mxu0 %v2632_v26  ;;  %2025 = vmatpush1.bf16.msra.mxu1 %v2635_v27  ;;  %v2725_v26 = vld [vmem:[#allocation7 + $0x228] ss:$16 sps:$4 sm:$0xff]   ;;  %v2730_v27 = vld [vmem:[#allocation7 + $0x244] ss:$16 sps:$4 sm:$0xff]  }
 0x141   :  { %1944 = vmatprep.subr.bf16.mxu0 %v2640_v28  ;;  %2026 = vmatprep.subr.bf16.mxu1 %v2643_v29  ;;  %v2733_v28 = vld [vmem:[#allocation7 + $0x24c] ss:$16 sps:$4 sm:$0xff]   ;;  %v2728_v29 = vld [vmem:[#allocation7 + $0x240] ss:$16 sps:$4 sm:$0xff]  }
 0x144   :  { %1945 = vmatpush1.bf16.msra.mxu0 %v2638_v30  ;;  %2027 = vmatpush1.bf16.msra.mxu1 %v2641_v31  ;;  %v2731_v30 = vld [vmem:[#allocation7 + $0x248] ss:$16 sps:$4 sm:$0xff]   ;;  %v2736_v31 = vld [vmem:[#allocation7 + $0x264] ss:$16 sps:$4 sm:$0xff]  }
 0x145   :  { %1946 = vmatprep.subr.bf16.mxu0 %v2646_v32  ;;  %2028 = vmatprep.subr.bf16.mxu1 %v2649_v33  ;;  %v2734_v32 = vld [vmem:[#allocation7 + $0x260] ss:$16 sps:$4 sm:$0xff]   ;;  %v2737_v33 = vld [vmem:[#allocation7 + $0x268] ss:$16 sps:$4 sm:$0xff]  }
 0x148   :  { %1947 = vmatpush1.bf16.msra.mxu0 %v2644_v34  ;;  %2029 = vmatpush1.bf16.msra.mxu1 %v2647_v48  ;;  %v2742_v34 = vld [vmem:[#allocation7 + $0x284] ss:$16 sps:$4 sm:$0xff]   ;;  %v2745_v48 = vld [vmem:[#allocation7 + $0x28c] ss:$16 sps:$4 sm:$0xff]  }
 0x149   :  { %1948 = vmatprep.subr.bf16.mxu0 %v2652_v35  ;;  %2030 = vmatprep.subr.bf16.mxu1 %v2655_v36  ;;  %v2740_v35 = vld [vmem:[#allocation7 + $0x280] ss:$16 sps:$4 sm:$0xff]   ;;  %v2748_v36 = vld [vmem:[#allocation7 + $0x2a4] ss:$16 sps:$4 sm:$0xff]  }
 0x14c   :  { %1949 = vmatpush1.bf16.msra.mxu0 %v2650_v37  ;;  %2031 = vmatpush1.bf16.msra.mxu1 %v2653_v38  ;;  %v2751_v37 = vld [vmem:[#allocation7 + $0x2ac] ss:$16 sps:$4 sm:$0xff]   ;;  %v2746_v38 = vld [vmem:[#allocation7 + $0x2a0] ss:$16 sps:$4 sm:$0xff]  }
 0x14d   :  { %1950 = vmatprep.subr.bf16.mxu0 %v2658_v39  ;;  %2032 = vmatprep.subr.bf16.mxu1 %v2661_v40  ;;  %v2749_v39 = vld [vmem:[#allocation7 + $0x2a8] ss:$16 sps:$4 sm:$0xff]   ;;  %v2754_v40 = vld [vmem:[#allocation7 + $0x2c4] ss:$16 sps:$4 sm:$0xff]  }
 0x150   :  { %1951 = vmatpush1.bf16.msra.mxu0 %v2656_v41  ;;  %2033 = vmatpush1.bf16.msra.mxu1 %v2659_v42  ;;  %v2757_v41 = vld [vmem:[#allocation7 + $0x2cc] ss:$16 sps:$4 sm:$0xff]   ;;  %v2752_v42 = vld [vmem:[#allocation7 + $0x2c0] ss:$16 sps:$4 sm:$0xff]  }
 0x151   :  { %1952 = vmatprep.subr.bf16.mxu0 %v2664_v43  ;;  %2034 = vmatprep.subr.bf16.mxu1 %v2667_v44  ;;  %v2755_v43 = vld [vmem:[#allocation7 + $0x2c8] ss:$16 sps:$4 sm:$0xff]   ;;  %v2760_v44 = vld [vmem:[#allocation7 + $0x2e4] ss:$16 sps:$4 sm:$0xff]  }
 0x154   :  { %1953 = vmatpush1.bf16.msra.mxu0 %v2662_v45  ;;  %2035 = vmatpush1.bf16.msra.mxu1 %v2665_v47  ;;  %v2763_v45 = vld [vmem:[#allocation7 + $0x2ec] ss:$16 sps:$4 sm:$0xff]   ;;  %v2758_v47 = vld [vmem:[#allocation7 + $0x2e0] ss:$16 sps:$4 sm:$0xff]  }
 0x155   :  { %1954 = vmatprep.subr.bf16.mxu0 %v2670_v49  ;;  %2036 = vmatprep.subr.bf16.mxu1 %v2673_v50  ;;  %v2761_v49 = vld [vmem:[#allocation7 + $0x2e8] ss:$16 sps:$4 sm:$0xff]   ;;  %v2766_v50 = vld [vmem:[#allocation7 + $0x304] ss:$16 sps:$4 sm:$0xff]  }
 0x158   :  { %1955 = vmatpush1.bf16.msra.mxu0 %v2668_v51  ;;  %2037 = vmatpush1.bf16.msra.mxu1 %v2671_v53  ;;  %v2769_v51 = vld [vmem:[#allocation7 + $0x30c] ss:$16 sps:$4 sm:$0xff]   ;;  %v2764_v53 = vld [vmem:[#allocation7 + $0x300] ss:$16 sps:$4 sm:$0xff]  }
 0x159   :  { %1956 = vmatprep.subr.bf16.mxu0 %v2676_v55  ;;  %2038 = vmatprep.subr.bf16.mxu1 %v2679_v57  ;;  %v2767_v55 = vld [vmem:[#allocation7 + $0x308] ss:$16 sps:$4 sm:$0xff]   ;;  %v2772_v57 = vld [vmem:[#allocation7 + $0x324] ss:$16 sps:$4 sm:$0xff]  }
 0x15c   :  { %1957 = vmatpush1.bf16.msra.mxu0 %v2674_v58  ;;  %2039 = vmatpush1.bf16.msra.mxu1 %v2677_v61  ;;  %v2775_v58 = vld [vmem:[#allocation7 + $0x32c] ss:$16 sps:$4 sm:$0xff]   ;;  %v2770_v61 = vld [vmem:[#allocation7 + $0x320] ss:$16 sps:$4 sm:$0xff]  }
 0x15d   :  { %1958 = vmatprep.subr.bf16.mxu0 %v2682_v62  ;;  %2040 = vmatprep.subr.bf16.mxu1 %v2685_v63  ;;  %v2773_v62 = vld [vmem:[#allocation7 + $0x328] ss:$16 sps:$4 sm:$0xff]   ;;  %v2778_v63 = vld [vmem:[#allocation7 + $0x344] ss:$16 sps:$4 sm:$0xff]  }
 0x160   :  { %1959 = vmatpush1.bf16.msra.mxu0 %v2680_v0  ;;  %2041 = vmatpush1.bf16.msra.mxu1 %v2683_v2  ;;  %v2781_v0 = vld [vmem:[#allocation7 + $0x34c] ss:$16 sps:$4 sm:$0xff]   ;;  %v2776_v2 = vld [vmem:[#allocation7 + $0x340] ss:$16 sps:$4 sm:$0xff]  }
 0x161   :  { %1960 = vmatprep.subr.bf16.mxu0 %v2688_v3  ;;  %2042 = vmatprep.subr.bf16.mxu1 %v2691_v4  ;;  %v2779_v3 = vld [vmem:[#allocation7 + $0x348] ss:$16 sps:$4 sm:$0xff]   ;;  %v2784_v4 = vld [vmem:[#allocation7 + $0x364] ss:$16 sps:$4 sm:$0xff]  }
 0x164   :  { %1961 = vmatpush1.bf16.msra.mxu0 %v2686_v5  ;;  %2043 = vmatpush1.bf16.msra.mxu1 %v2689_v56  ;;  %v2787_v5 = vld [vmem:[#allocation7 + $0x36c] ss:$16 sps:$4 sm:$0xff]   ;;  %v2782_v56 = vld [vmem:[#allocation7 + $0x360] ss:$16 sps:$4 sm:$0xff]  }
 0x165   :  { %1962 = vmatprep.subr.bf16.mxu0 %v2694_v6  ;;  %2044 = vmatprep.subr.bf16.mxu1 %v2697_v11  ;;  %v2785_v6 = vld [vmem:[#allocation7 + $0x368] ss:$16 sps:$4 sm:$0xff]   ;;  %v2790_v11 = vld [vmem:[#allocation7 + $0x384] ss:$16 sps:$4 sm:$0xff]  }
 0x168   :  { %1963 = vmatpush1.bf16.msra.mxu0 %v2692_v9  ;;  %2045 = vmatpush1.bf16.msra.mxu1 %v2695_v54  ;;  %v2793_v9 = vld [vmem:[#allocation7 + $0x38c] ss:$16 sps:$4 sm:$0xff]   ;;  %v2788_v54 = vld [vmem:[#allocation7 + $0x380] ss:$16 sps:$4 sm:$0xff]  }
 0x169   :  { %1964 = vmatprep.subr.bf16.mxu0 %v2700_v59  ;;  %2046 = vmatprep.subr.bf16.mxu1 %v2703_v13  ;;  %v2791_v59 = vld [vmem:[#allocation7 + $0x388] ss:$16 sps:$4 sm:$0xff]   ;;  %v2796_v13 = vld [vmem:[#allocation7 + $0x3a4] ss:$16 sps:$4 sm:$0xff]  }
 0x16c   :  { %1965 = vmatpush1.bf16.msra.mxu0 %v2698_v1  ;;  %2047 = vmatpush1.bf16.msra.mxu1 %v2701_v52  ;;  %v2799_v1 = vld [vmem:[#allocation7 + $0x3ac] ss:$16 sps:$4 sm:$0xff]   ;;  %v2794_v52 = vld [vmem:[#allocation7 + $0x3a0] ss:$16 sps:$4 sm:$0xff]  }
 0x16d   :  { %1966 = vmatprep.subr.bf16.mxu0 %v2706_v14  ;;  %2048 = vmatprep.subr.bf16.mxu1 %v2709_v15  ;;  %v2797_v14 = vld [vmem:[#allocation7 + $0x3a8] ss:$16 sps:$4 sm:$0xff]   ;;  %v2802_v15 = vld [vmem:[#allocation7 + $0x3c4] ss:$16 sps:$4 sm:$0xff]  }
 0x170   :  { %1967 = vmatpush1.bf16.msra.mxu0 %v2704_v16  ;;  %2049 = vmatpush1.bf16.msra.mxu1 %v2707_v17  ;;  %v2805_v16 = vld [vmem:[#allocation7 + $0x3cc] ss:$16 sps:$4 sm:$0xff]   ;;  %v2800_v17 = vld [vmem:[#allocation7 + $0x3c0] ss:$16 sps:$4 sm:$0xff]  }
 0x171   :  { %1968 = vmatprep.subr.bf16.mxu0 %v2712_v7  ;;  %2050 = vmatprep.subr.bf16.mxu1 %v2715_v18  ;;  %v2803_v7 = vld [vmem:[#allocation7 + $0x3c8] ss:$16 sps:$4 sm:$0xff]   ;;  %v2808_v18 = vld [vmem:[#allocation7 + $0x3e4] ss:$16 sps:$4 sm:$0xff]  }
 0x174   :  { %1969 = vmatpush1.bf16.msra.mxu0 %v2710_v20  ;;  %2051 = vmatpush1.bf16.msra.mxu1 %v2713_v8  ;;  %v2811_v20 = vld [vmem:[#allocation7 + $0x3ec] ss:$16 sps:$4 sm:$0xff]   ;;  %v2806_v8 = vld [vmem:[#allocation7 + $0x3e0] ss:$16 sps:$4 sm:$0xff]  }
 0x175   :  { %1979 = vmatprep.subr.bf16.mxu0 %v2718_v10  ;;  %2061 = vmatprep.subr.bf16.mxu1 %v2721_v21  ;;  %v2809_v10 = vld [vmem:[#allocation7 + $0x3e8] ss:$16 sps:$4 sm:$0xff]  }
 0x177   :  { %1971 = vmatmul.mubr.bf16.vlgmr.msra.gmra.mrb[0].mxu0 %v3616_v19  ;;  %2053 = vmatmul.mubr.bf16.vlgmr.msra.gmra.mrb[0].mxu1 %v3616_v19  ;;  %v2739_v19 = vld [vmem:[#allocation7 + $0x26c] ss:$16 sps:$4 sm:$0xff]  }
 0x178   :  { %1980 = vmatpush1.bf16.msra.mxu0 %v2716_v22  ;;  %2062 = vmatpush1.bf16.msra.mxu1 %v2719_v60 }
 0x179   :  { %1981 = vmatprep.subr.bf16.mxu0 %v2724_v46  ;;  %2063 = vmatprep.subr.bf16.mxu1 %v2727_v25 }
 0x17a   :  { %2011 = vmatprep.mubr.bf16.mxu0 %v3621_v24  ;;  %2093 = vmatprep.mubr.bf16.mxu1 %v3621_v24  ;;  %v2743_v24 = vld [vmem:[#allocation7 + $0x288] ss:$16 sps:$4 sm:$0xff]  }
 0x17c   :  { %1982 = vmatpush1.bf16.msra.mxu0 %v2722_v12  ;;  %2064 = vmatpush1.bf16.msra.mxu1 %v2725_v26 }
 0x17d   :  { %1983 = vmatprep.subr.bf16.mxu0 %v2730_v27  ;;  %2065 = vmatprep.subr.bf16.mxu1 %v2733_v28 }
 0x180   :  { %1984 = vmatpush1.bf16.msra.mxu0 %v2728_v29  ;;  %2066 = vmatpush1.bf16.msra.mxu1 %v2731_v30 }
 0x181   :  { %1985 = vmatprep.subr.bf16.mxu0 %v2736_v31  ;;  %2067 = vmatprep.subr.bf16.mxu1 %v2739_v19 }
 0x184   :  { %1986 = vmatpush1.bf16.msra.mxu0 %v2734_v32  ;;  %2068 = vmatpush1.bf16.msra.mxu1 %v2737_v33 }
 0x185   :  { %1987 = vmatprep.subr.bf16.mxu0 %v2742_v34  ;;  %2069 = vmatprep.subr.bf16.mxu1 %v2745_v48 }
 0x188   :  { %1988 = vmatpush1.bf16.msra.mxu0 %v2740_v35  ;;  %2070 = vmatpush1.bf16.msra.mxu1 %v2743_v24 }
 0x189   :  { %1989 = vmatprep.subr.bf16.mxu0 %v2748_v36  ;;  %2071 = vmatprep.subr.bf16.mxu1 %v2751_v37 }
 0x18c   :  { %1990 = vmatpush1.bf16.msra.mxu0 %v2746_v38  ;;  %2072 = vmatpush1.bf16.msra.mxu1 %v2749_v39 }
 0x18d   :  { %1991 = vmatprep.subr.bf16.mxu0 %v2754_v40  ;;  %2073 = vmatprep.subr.bf16.mxu1 %v2757_v41 }
 0x190   :  { %1992 = vmatpush1.bf16.msra.mxu0 %v2752_v42  ;;  %2074 = vmatpush1.bf16.msra.mxu1 %v2755_v43 }
 0x191   :  { %1993 = vmatprep.subr.bf16.mxu0 %v2760_v44  ;;  %2075 = vmatprep.subr.bf16.mxu1 %v2763_v45 }
 0x194   :  { %1994 = vmatpush1.bf16.msra.mxu0 %v2758_v47  ;;  %2076 = vmatpush1.bf16.msra.mxu1 %v2761_v49 }
 0x195   :  { %1995 = vmatprep.subr.bf16.mxu0 %v2766_v50  ;;  %2077 = vmatprep.subr.bf16.mxu1 %v2769_v51 }
 0x198   :  { %1996 = vmatpush1.bf16.msra.mxu0 %v2764_v53  ;;  %2078 = vmatpush1.bf16.msra.mxu1 %v2767_v55 }
 0x199   :  { %1997 = vmatprep.subr.bf16.mxu0 %v2772_v57  ;;  %2079 = vmatprep.subr.bf16.mxu1 %v2775_v58 }
 0x19c   :  { %1998 = vmatpush1.bf16.msra.mxu0 %v2770_v61  ;;  %2080 = vmatpush1.bf16.msra.mxu1 %v2773_v62 }
 0x19d   :  { %1999 = vmatprep.subr.bf16.mxu0 %v2778_v63  ;;  %2081 = vmatprep.subr.bf16.mxu1 %v2781_v0 }
 0x1a0   :  { %2000 = vmatpush1.bf16.msra.mxu0 %v2776_v2  ;;  %2082 = vmatpush1.bf16.msra.mxu1 %v2779_v3 }
 0x1a1   :  { %2001 = vmatprep.subr.bf16.mxu0 %v2784_v4  ;;  %2083 = vmatprep.subr.bf16.mxu1 %v2787_v5 }
 0x1a4   :  { %2002 = vmatpush1.bf16.msra.mxu0 %v2782_v56  ;;  %2084 = vmatpush1.bf16.msra.mxu1 %v2785_v6 }
 0x1a5   :  { %2003 = vmatprep.subr.bf16.mxu0 %v2790_v11  ;;  %2085 = vmatprep.subr.bf16.mxu1 %v2793_v9 }
 0x1a8   :  { %2004 = vmatpush1.bf16.msra.mxu0 %v2788_v54  ;;  %2086 = vmatpush1.bf16.msra.mxu1 %v2791_v59 }
 0x1a9   :  { %2005 = vmatprep.subr.bf16.mxu0 %v2796_v13  ;;  %2087 = vmatprep.subr.bf16.mxu1 %v2799_v1 }
 0x1ac   :  { %2006 = vmatpush1.bf16.msra.mxu0 %v2794_v52  ;;  %2088 = vmatpush1.bf16.msra.mxu1 %v2797_v14 }
 0x1ad   :  { %2007 = vmatprep.subr.bf16.mxu0 %v2802_v15  ;;  %2089 = vmatprep.subr.bf16.mxu1 %v2805_v16 }
 0x1b0   :  { %2008 = vmatpush1.bf16.msra.mxu0 %v2800_v17  ;;  %2090 = vmatpush1.bf16.msra.mxu1 %v2803_v7 }
 0x1b1   :  { %2009 = vmatprep.subr.bf16.mxu0 %v2808_v18  ;;  %2091 = vmatprep.subr.bf16.mxu1 %v2811_v20 }
 0x1b4   :  { %2010 = vmatpush1.bf16.msra.mxu0 %v2806_v8  ;;  %2092 = vmatpush1.bf16.msra.mxu1 %v2809_v10 }
 0x1b7   :  { %2012 = vmatmul.mubr.bf16.vlgmr.msra.gmra.mrb[0].mxu0 %v3673_v23  ;;  %2094 = vmatmul.mubr.bf16.vlgmr.msra.gmra.mrb[0].mxu1 %v3673_v23 }
 0x28a   :  { %v2013_v21 = vpop.f32.mrb[0].mxu0  ;;  %v2095_v22 = vpop.f32.mrb[0].mxu1 }
 0x28b   :  { %2106 = vst [vmem:[#allocation8] sm:$0xff] %v2013_v21  ;;  %2108 = vst [vmem:[#allocation8 + $0x10] sm:$0xff] %v2095_v22  ;;  %v2015_v60 = vpop.f32.mrb[1].mxu0  ;;  %v2097_v46 = vpop.f32.mrb[1].mxu1 }
 0x28c   :  { %2107 = vst [vmem:[#allocation8 + $0x8] sm:$0xff] %v2015_v60  ;;  %2109 = vst [vmem:[#allocation8 + $0x18] sm:$0xff] %v2097_v46  ;;  %v2017_v25 = vpop.f32.mrb[2].mxu0  ;;  %v2099_v12 = vpop.f32.mrb[2].mxu1 }
 0x28d   :  { %v2018_v26 = vpop.f32.mrb[3].mxu0  ;;  %v2100_v27 = vpop.f32.mrb[3].mxu1 }
 0x28e   :  { %2904 = shalt.err (!%p2901_p0)
}
 0x28f   :  { %s2905_s25 = scalar_lea.hbm %s3484_s3, 512 }
 0x290   :  { %p2906_p1 = scmp.ne.s32.totalorder %s3484_s3, %s2905_s25  ;;  %p2909_p2 = scmp.lt.u32.totalorder %s2905_s25, %s3484_s3 }
 0x292   :  { %p2911_p3 = pnand %p2909_p2, %p2906_p1 }
 0x294   :  { %2914 = shalt.err (!%p2911_p3)
}
 0x295   :  { %2119 = dma.vmem_to_hbm [thread:$0]  %s2117_s21, 512, %s3484_s3, [#allocation4]  }
 0x296   :  { %2919 = dma.done.wait [#allocation4], 512  }
 0x297   :  { %2920 = vsyncadd [#allocation4], 4294966784 }
 0x298   :  { %2123 = vsyncpa [#allocation3], 1 }
 0x299   :  { %2124 = vsyncpa [#allocation6], 1 }
 0x29a   :  { %2125 = vsyncpa [#allocation4], 1 }

</bundles_post_ra>
